<compile_context>
chip_gen: v5e
topology: v5e:2x2
jax: 0.10.0
libtpu: 0.0.40
codegen_flags: <defaults>
</compile_context>

<pallas_src>
import functools
import math

import jax
import jax.numpy as jnp
from jax.experimental import pallas as pl
from jax.experimental.pallas import tpu as pltpu


SELU_ALPHA = 1.6732632423543772
SELU_SCALE = 1.0507009873554805


def _selu(x):
    # exp only on the clamped (non-positive) branch to avoid overflow garbage.
    return SELU_SCALE * jnp.where(
        x > 0.0, x, SELU_ALPHA * (jnp.exp(jnp.minimum(x, 0.0)) - 1.0))


def _sigmoid(x):
    return 1.0 / (1.0 + jnp.exp(-x))


def _snp(x, skip_w, skip_b, w1, b1, w2, b2, g1w, g1b, g2w, g2b, has_skip):
    """SelfNormalizingPrimingNetwork on a 2-D [rows, features] block (eval mode)."""
    if has_skip:
        residual = jnp.dot(x, skip_w, preferred_element_type=jnp.float32) + skip_b
    else:
        residual = x
    h = _selu(jnp.dot(x, w1, preferred_element_type=jnp.float32) + b1)
    y = jnp.dot(h, w2, preferred_element_type=jnp.float32) + b2
    # TODO(synk): nn.Dropout has no inference-time effect; implemented as identity.
    gate = _sigmoid(jnp.dot(y, g1w, preferred_element_type=jnp.float32) + g1b)
    lin = jnp.dot(y, g2w, preferred_element_type=jnp.float32) + g2b
    return gate * lin + residual


def _vpn_kernel(emb_ref,
                fs_skip_w, fs_skip_b, fs_w1, fs_b1, fs_w2, fs_b2,
                fs_g1w, fs_g1b, fs_g2w, fs_g2b,
                sv_skip_w, sv_skip_b, sv_w1, sv_b1, sv_w2, sv_b2,
                sv_g1w, sv_g1b, sv_g2w, sv_g2b,
                out_ref, sw_ref,
                *, num_inputs, input_size, fs_has_skip, sv_has_skip):
    emb = emb_ref[...]                                        # [TM, N*I] f32

    # ---- flattened SNP -> variable-selection logits [TM, N] ------------------
    logits = _snp(emb,
                  fs_skip_w[...], fs_skip_b[...],
                  fs_w1[...], fs_b1[...],
                  fs_w2[...], fs_b2[...],
                  fs_g1w[...], fs_g1b[...],
                  fs_g2w[...], fs_g2b[...],
                  fs_has_skip)

    # softmax over the variable (last) axis
    m = jnp.max(logits, axis=-1, keepdims=True)
    e = jnp.exp(logits - m)
    sw = e / jnp.sum(e, axis=-1, keepdims=True)               # [TM, N]
    sw_ref[...] = sw

    # ---- per-variable SNPs, combined in place (no [.., H, N] stack in HBM) ---
    sv_skip_w_a = sv_skip_w[...]
    sv_skip_b_a = sv_skip_b[...]
    sv_w1_a, sv_b1_a = sv_w1[...], sv_b1[...]
    sv_w2_a, sv_b2_a = sv_w2[...], sv_b2[...]
    sv_g1w_a, sv_g1b_a = sv_g1w[...], sv_g1b[...]
    sv_g2w_a, sv_g2b_a = sv_g2w[...], sv_g2b[...]

    acc = jnp.zeros(out_ref.shape, jnp.float32)               # [TM, H]
    for n in range(num_inputs):                               # static unroll (N small)
        x_n = emb[:, n * input_size:(n + 1) * input_size]     # [TM, I]
        out_n = _snp(x_n,
                     sv_skip_w_a[n], sv_skip_b_a[n:n + 1, :],
                     sv_w1_a[n], sv_b1_a[n:n + 1, :],
                     sv_w2_a[n], sv_b2_a[n:n + 1, :],
                     sv_g1w_a[n], sv_g1b_a[n:n + 1, :],
                     sv_g2w_a[n], sv_g2b_a[n:n + 1, :],
                     sv_has_skip)
        acc = acc + out_n * sw[:, n:n + 1]
    out_ref[...] = acc


def _round_up(x, m):
    return (x + m - 1) // m * m


def variable_priming_network(embedding, params, *, input_size, num_inputs,
                             hidden_size, row_block=256):
    """embedding: [B, T, num_inputs*input_size] -> (outputs [B,T,H], sparse_w [B,T,1,N])."""
    B, T, F = embedding.shape
    I, N, H = input_size, num_inputs, hidden_size
    assert F == N * I
    fs_has_skip = (N * I) != N       # flattened SNP: input_size != output_size
    sv_has_skip = I != H             # per-variable SNPs

    # Flatten (batch, time) into a single lane-dense row axis and tile it.
    M = B * T
    if M <= row_block:
        TM = _round_up(M, 8)
        M_pad = TM
    else:
        TM = row_block               # multiple of 8
        M_pad = _round_up(M, TM)

    x2d = embedding.reshape(M, F).astype(jnp.float32)
    if M_pad != M:
        x2d = jnp.pad(x2d, ((0, M_pad - M), (0, 0)))

    (fs_skip_w, fs_skip_b, fs_w1, fs_b1, fs_w2, fs_b2,
     fs_g1w, fs_g1b, fs_g2w, fs_g2b,
     sv_skip_w, sv_skip_b, sv_w1, sv_b1, sv_w2, sv_b2,
     sv_g1w, sv_g1b, sv_g2w, sv_g2b) = params

    # Weights are tiny: hold the full arrays resident in VMEM for every grid step.
    full2d = lambda a: pl.BlockSpec(a.shape, lambda m: (0, 0))
    full3d = lambda a: pl.BlockSpec(a.shape, lambda m: (0, 0, 0))

    kernel = functools.partial(
        _vpn_kernel,
        num_inputs=N, input_size=I,
        fs_has_skip=fs_has_skip, sv_has_skip=sv_has_skip)

    out2d, sw2d = pl.pallas_call(
        kernel,
        out_shape=(jax.ShapeDtypeStruct((M_pad, H), jnp.float32),
                   jax.ShapeDtypeStruct((M_pad, N), jnp.float32)),
        grid_spec=pltpu.PrefetchScalarGridSpec(
            num_scalar_prefetch=0,
            grid=(M_pad // TM,),
            in_specs=[
                pl.BlockSpec((TM, F), lambda m: (m, 0)),      # embedding row block
                full2d(fs_skip_w), full2d(fs_skip_b),
                full2d(fs_w1), full2d(fs_b1),
                full2d(fs_w2), full2d(fs_b2),
                full2d(fs_g1w), full2d(fs_g1b),
                full2d(fs_g2w), full2d(fs_g2b),
                full3d(sv_skip_w), full2d(sv_skip_b),
                full3d(sv_w1), full2d(sv_b1),
                full3d(sv_w2), full2d(sv_b2),
                full3d(sv_g1w), full2d(sv_g1b),
                full3d(sv_g2w), full2d(sv_g2b),
            ],
            out_specs=(pl.BlockSpec((TM, H), lambda m: (m, 0)),
                       pl.BlockSpec((TM, N), lambda m: (m, 0))),
        ),
        compiler_params=pltpu.CompilerParams(
            dimension_semantics=("parallel",),
        ),
    )(x2d,
      fs_skip_w, fs_skip_b, fs_w1, fs_b1, fs_w2, fs_b2,
      fs_g1w, fs_g1b, fs_g2w, fs_g2b,
      sv_skip_w, sv_skip_b, sv_w1, sv_b1, sv_w2, sv_b2,
      sv_g1w, sv_g1b, sv_g2w, sv_g2b)

    outputs = out2d[:M].reshape(B, T, H).astype(embedding.dtype)
    sparse_w = sw2d[:M].reshape(B, T, N)[:, :, None, :].astype(embedding.dtype)  # unsqueeze(2)
    return outputs, sparse_w


def init_params(key, *, input_size, num_inputs, hidden_size):
    """PyTorch-style Linear init; per-variable SNP weights stacked along axis 0."""
    I, N, H = input_size, num_inputs, hidden_size
    Fin = N * I

    def linear(k, fan_in, fan_out):
        kw, kb = jax.random.split(k)
        bound = 1.0 / math.sqrt(fan_in)
        w = jax.random.uniform(kw, (fan_in, fan_out), jnp.float32, -bound, bound)
        b = jax.random.uniform(kb, (fan_out,), jnp.float32, -bound, bound)
        return w, b

    keys = jax.random.split(key, 10)
    fs_skip_w, fs_skip_b = linear(keys[0], Fin, N)
    fs_w1, fs_b1 = linear(keys[1], Fin, H)
    fs_w2, fs_b2 = linear(keys[2], H, N)
    fs_g1w, fs_g1b = linear(keys[3], N, N)
    fs_g2w, fs_g2b = linear(keys[4], N, N)

    def stacked(k, fan_in, fan_out):
        ws, bs = [], []
        for kk in jax.random.split(k, N):
            w, b = linear(kk, fan_in, fan_out)
            ws.append(w)
            bs.append(b)
        return jnp.stack(ws), jnp.stack(bs)

    sv_skip_w, sv_skip_b = stacked(keys[5], I, H)
    sv_w1, sv_b1 = stacked(keys[6], I, H)
    sv_w2, sv_b2 = stacked(keys[7], H, H)
    sv_g1w, sv_g1b = stacked(keys[8], H, H)
    sv_g2w, sv_g2b = stacked(keys[9], H, H)

    r = lambda b: b.reshape(1, -1)   # 1-D biases -> lane-dense (1, out) rows
    return (fs_skip_w, r(fs_skip_b), fs_w1, r(fs_b1), fs_w2, r(fs_b2),
            fs_g1w, r(fs_g1b), fs_g2w, r(fs_g2b),
            sv_skip_w, sv_skip_b, sv_w1, sv_b1, sv_w2, sv_b2,
            sv_g1w, sv_g1b, sv_g2w, sv_g2b)


def _reference(embedding, params, *, input_size, num_inputs, hidden_size):
    """Pure-JAX reference mirroring the PyTorch forward (eval mode)."""
    I, N, H = input_size, num_inputs, hidden_size
    (fs_skip_w, fs_skip_b, fs_w1, fs_b1, fs_w2, fs_b2,
     fs_g1w, fs_g1b, fs_g2w, fs_g2b,
     sv_skip_w, sv_skip_b, sv_w1, sv_b1, sv_w2, sv_b2,
     sv_g1w, sv_g1b, sv_g2w, sv_g2b) = params

    def snp(x, skip_w, skip_b, w1, b1, w2, b2, g1w, g1b, g2w, g2b, has_skip):
        residual = x @ skip_w + skip_b if has_skip else x
        h = jax.nn.selu(x @ w1 + b1)
        y = h @ w2 + b2
        return jax.nn.sigmoid(y @ g1w + g1b) * (y @ g2w + g2b) + residual

    x = embedding.astype(jnp.float32)
    logits = snp(x, fs_skip_w, fs_skip_b, fs_w1, fs_b1, fs_w2, fs_b2,
                 fs_g1w, fs_g1b, fs_g2w, fs_g2b, (N * I) != N)
    sw = jax.nn.softmax(logits, axis=-1)
    outs = []
    for n in range(N):
        xn = x[..., n * I:(n + 1) * I]
        outs.append(snp(xn, sv_skip_w[n], sv_skip_b[n], sv_w1[n], sv_b1[n],
                        sv_w2[n], sv_b2[n], sv_g1w[n], sv_g1b[n],
                        sv_g2w[n], sv_g2b[n], I != H))
    var_outputs = jnp.stack(outs, axis=-1)                    # [B, T, H, N]
    outputs = (var_outputs * sw[..., None, :]).sum(axis=-1)   # [B, T, H]
    return outputs, sw[:, :, None, :]


if __name__ == "__main__":
    batch, time_steps = 2, 8
    input_size, num_inputs, hidden_size = 8, 4, 32

    key = jax.random.PRNGKey(0)
    k_emb, k_par = jax.random.split(key)
    embedding = jax.random.normal(
        k_emb, (batch, time_steps, num_inputs * input_size), dtype=jnp.float32)
    params = init_params(k_par, input_size=input_size,
                         num_inputs=num_inputs, hidden_size=hidden_size)

    outputs, sparse_w = variable_priming_network(
        embedding, params, input_size=input_size,
        num_inputs=num_inputs, hidden_size=hidden_size)
    outputs, sparse_w = jax.block_until_ready((outputs, sparse_w))

    ref_out, ref_sw = _reference(embedding, params, input_size=input_size,
                                 num_inputs=num_inputs, hidden_size=hidden_size)

    assert outputs.shape == (batch, time_steps, hidden_size)
    assert sparse_w.shape == (batch, time_steps, 1, num_inputs)
    assert jnp.allclose(outputs, ref_out, atol=1e-4, rtol=1e-4), "outputs mismatch vs reference"
    assert jnp.allclose(sparse_w, ref_sw, atol=1e-5, rtol=1e-5), "sparse_weights mismatch vs reference"

    print("KERNEL_OK")
</pallas_src>

<mosaic_0001>
module attributes {stable_mosaic.version = 11 : i64} {
  func.func @_vpn_kernel(%arg0: i32, %arg1: memref<16x32xf32, #tpu.memory_space<vmem>>, %arg2: memref<32x4xf32, #tpu.memory_space<vmem>>, %arg3: memref<1x4xf32, #tpu.memory_space<vmem>>, %arg4: memref<32x32xf32, #tpu.memory_space<vmem>>, %arg5: memref<1x32xf32, #tpu.memory_space<vmem>>, %arg6: memref<32x4xf32, #tpu.memory_space<vmem>>, %arg7: memref<1x4xf32, #tpu.memory_space<vmem>>, %arg8: memref<4x4xf32, #tpu.memory_space<vmem>>, %arg9: memref<1x4xf32, #tpu.memory_space<vmem>>, %arg10: memref<4x4xf32, #tpu.memory_space<vmem>>, %arg11: memref<1x4xf32, #tpu.memory_space<vmem>>, %arg12: memref<4x8x32xf32, #tpu.memory_space<vmem>>, %arg13: memref<4x32xf32, #tpu.memory_space<vmem>>, %arg14: memref<4x8x32xf32, #tpu.memory_space<vmem>>, %arg15: memref<4x32xf32, #tpu.memory_space<vmem>>, %arg16: memref<4x32x32xf32, #tpu.memory_space<vmem>>, %arg17: memref<4x32xf32, #tpu.memory_space<vmem>>, %arg18: memref<4x32x32xf32, #tpu.memory_space<vmem>>, %arg19: memref<4x32xf32, #tpu.memory_space<vmem>>, %arg20: memref<4x32x32xf32, #tpu.memory_space<vmem>>, %arg21: memref<4x32xf32, #tpu.memory_space<vmem>>, %arg22: memref<16x32xf32, #tpu.memory_space<vmem>>, %arg23: memref<16x4xf32, #tpu.memory_space<vmem>>) attributes {dimension_semantics = [#tpu.dimension_semantics<parallel>], iteration_bounds = array<i64: 1>, scalar_prefetch = 0 : i64, scratch_operands = 0 : i64, tpu.core_type = #tpu.core_type<tc>, window_params = [{transform_indices = @transform_0, window_bounds = array<i64: 16, 32>}, {pipeline_mode = #tpu.pipeline_mode<synchronous>, transform_indices = @transform_1, window_bounds = array<i64: 32, 4>}, {pipeline_mode = #tpu.pipeline_mode<synchronous>, transform_indices = @transform_2, window_bounds = array<i64: 1, 4>}, {pipeline_mode = #tpu.pipeline_mode<synchronous>, transform_indices = @transform_3, window_bounds = array<i64: 32, 32>}, {pipeline_mode = #tpu.pipeline_mode<synchronous>, transform_indices = @transform_4, window_bounds = array<i64: 1, 32>}, {pipeline_mode = #tpu.pipeline_mode<synchronous>, transform_indices = @transform_5, window_bounds = array<i64: 32, 4>}, {pipeline_mode = #tpu.pipeline_mode<synchronous>, transform_indices = @transform_6, window_bounds = array<i64: 1, 4>}, {pipeline_mode = #tpu.pipeline_mode<synchronous>, transform_indices = @transform_7, window_bounds = array<i64: 4, 4>}, {pipeline_mode = #tpu.pipeline_mode<synchronous>, transform_indices = @transform_8, window_bounds = array<i64: 1, 4>}, {pipeline_mode = #tpu.pipeline_mode<synchronous>, transform_indices = @transform_9, window_bounds = array<i64: 4, 4>}, {pipeline_mode = #tpu.pipeline_mode<synchronous>, transform_indices = @transform_10, window_bounds = array<i64: 1, 4>}, {pipeline_mode = #tpu.pipeline_mode<synchronous>, transform_indices = @transform_11, window_bounds = array<i64: 4, 8, 32>}, {pipeline_mode = #tpu.pipeline_mode<synchronous>, transform_indices = @transform_12, window_bounds = array<i64: 4, 32>}, {pipeline_mode = #tpu.pipeline_mode<synchronous>, transform_indices = @transform_13, window_bounds = array<i64: 4, 8, 32>}, {pipeline_mode = #tpu.pipeline_mode<synchronous>, transform_indices = @transform_14, window_bounds = array<i64: 4, 32>}, {pipeline_mode = #tpu.pipeline_mode<synchronous>, transform_indices = @transform_15, window_bounds = array<i64: 4, 32, 32>}, {pipeline_mode = #tpu.pipeline_mode<synchronous>, transform_indices = @transform_16, window_bounds = array<i64: 4, 32>}, {pipeline_mode = #tpu.pipeline_mode<synchronous>, transform_indices = @transform_17, window_bounds = array<i64: 4, 32, 32>}, {pipeline_mode = #tpu.pipeline_mode<synchronous>, transform_indices = @transform_18, window_bounds = array<i64: 4, 32>}, {pipeline_mode = #tpu.pipeline_mode<synchronous>, transform_indices = @transform_19, window_bounds = array<i64: 4, 32, 32>}, {pipeline_mode = #tpu.pipeline_mode<synchronous>, transform_indices = @transform_20, window_bounds = array<i64: 4, 32>}, {transform_indices = @transform_21, window_bounds = array<i64: 16, 32>}, {transform_indices = @transform_22, window_bounds = array<i64: 16, 4>}]} {
    %c0 = arith.constant 0 : index
    %c0_0 = arith.constant 0 : index
    %0 = vector.load %arg1[%c0, %c0_0] : memref<16x32xf32, #tpu.memory_space<vmem>>, vector<16x32xf32>
    %c0_1 = arith.constant 0 : index
    %c0_2 = arith.constant 0 : index
    %1 = vector.load %arg2[%c0_1, %c0_2] : memref<32x4xf32, #tpu.memory_space<vmem>>, vector<32x4xf32>
    %c0_3 = arith.constant 0 : index
    %c0_4 = arith.constant 0 : index
    %2 = vector.load %arg3[%c0_3, %c0_4] : memref<1x4xf32, #tpu.memory_space<vmem>>, vector<1x4xf32>
    %c0_5 = arith.constant 0 : index
    %c0_6 = arith.constant 0 : index
    %3 = vector.load %arg4[%c0_5, %c0_6] : memref<32x32xf32, #tpu.memory_space<vmem>>, vector<32x32xf32>
    %c0_7 = arith.constant 0 : index
    %c0_8 = arith.constant 0 : index
    %4 = vector.load %arg5[%c0_7, %c0_8] : memref<1x32xf32, #tpu.memory_space<vmem>>, vector<1x32xf32>
    %c0_9 = arith.constant 0 : index
    %c0_10 = arith.constant 0 : index
    %5 = vector.load %arg6[%c0_9, %c0_10] : memref<32x4xf32, #tpu.memory_space<vmem>>, vector<32x4xf32>
    %c0_11 = arith.constant 0 : index
    %c0_12 = arith.constant 0 : index
    %6 = vector.load %arg7[%c0_11, %c0_12] : memref<1x4xf32, #tpu.memory_space<vmem>>, vector<1x4xf32>
    %c0_13 = arith.constant 0 : index
    %c0_14 = arith.constant 0 : index
    %7 = vector.load %arg8[%c0_13, %c0_14] : memref<4x4xf32, #tpu.memory_space<vmem>>, vector<4x4xf32>
    %c0_15 = arith.constant 0 : index
    %c0_16 = arith.constant 0 : index
    %8 = vector.load %arg9[%c0_15, %c0_16] : memref<1x4xf32, #tpu.memory_space<vmem>>, vector<1x4xf32>
    %c0_17 = arith.constant 0 : index
    %c0_18 = arith.constant 0 : index
    %9 = vector.load %arg10[%c0_17, %c0_18] : memref<4x4xf32, #tpu.memory_space<vmem>>, vector<4x4xf32>
    %c0_19 = arith.constant 0 : index
    %c0_20 = arith.constant 0 : index
    %10 = vector.load %arg11[%c0_19, %c0_20] : memref<1x4xf32, #tpu.memory_space<vmem>>, vector<1x4xf32>
    %cst = arith.constant dense<0.000000e+00> : vector<16x4xf32>
    %11 = tpu.matmul %0, %1, %cst {dimension_numbers = #tpu.dot_dimension_numbers<[1], [0], [0], [1], [0, 0, 1, 1], [], []>} : vector<16x32xf32>, vector<32x4xf32>, vector<16x4xf32> -> vector<16x4xf32>
    %12 = vector.broadcast %2 : vector<1x4xf32> to vector<16x4xf32>
    %13 = arith.addf %11, %12 : vector<16x4xf32>
    %cst_21 = arith.constant dense<0.000000e+00> : vector<16x32xf32>
    %14 = tpu.matmul %0, %3, %cst_21 {dimension_numbers = #tpu.dot_dimension_numbers<[1], [0], [0], [1], [0, 0, 1, 1], [], []>} : vector<16x32xf32>, vector<32x32xf32>, vector<16x32xf32> -> vector<16x32xf32>
    %15 = vector.broadcast %4 : vector<1x32xf32> to vector<16x32xf32>
    %16 = arith.addf %14, %15 : vector<16x32xf32>
    %cst_22 = arith.constant 0.000000e+00 : f32
    %17 = vector.broadcast %cst_22 : f32 to vector<16x32xf32>
    %18 = arith.cmpf ogt, %16, %17 : vector<16x32xf32>
    %cst_23 = arith.constant 0.000000e+00 : f32
    %19 = vector.broadcast %cst_23 : f32 to vector<16x32xf32>
    %20 = arith.minimumf %16, %19 : vector<16x32xf32>
    %21 = math.exp %20 : vector<16x32xf32>
    %cst_24 = arith.constant 1.000000e+00 : f32
    %22 = vector.broadcast %cst_24 : f32 to vector<16x32xf32>
    %23 = arith.subf %21, %22 : vector<16x32xf32>
    %cst_25 = arith.constant 1.67326319 : f32
    %24 = vector.broadcast %cst_25 : f32 to vector<16x32xf32>
    %25 = arith.mulf %24, %23 : vector<16x32xf32>
    %26 = arith.select %18, %16, %25 : vector<16x32xi1>, vector<16x32xf32>
    %cst_26 = arith.constant 1.05070102 : f32
    %27 = vector.broadcast %cst_26 : f32 to vector<16x32xf32>
    %28 = arith.mulf %27, %26 : vector<16x32xf32>
    %cst_27 = arith.constant dense<0.000000e+00> : vector<16x4xf32>
    %29 = tpu.matmul %28, %5, %cst_27 {dimension_numbers = #tpu.dot_dimension_numbers<[1], [0], [0], [1], [0, 0, 1, 1], [], []>} : vector<16x32xf32>, vector<32x4xf32>, vector<16x4xf32> -> vector<16x4xf32>
    %30 = vector.broadcast %6 : vector<1x4xf32> to vector<16x4xf32>
    %31 = arith.addf %29, %30 : vector<16x4xf32>
    %cst_28 = arith.constant dense<0.000000e+00> : vector<16x4xf32>
    %32 = tpu.matmul %31, %7, %cst_28 {dimension_numbers = #tpu.dot_dimension_numbers<[1], [0], [0], [1], [0, 0, 1, 1], [], []>} : vector<16x4xf32>, vector<4x4xf32>, vector<16x4xf32> -> vector<16x4xf32>
    %33 = vector.broadcast %8 : vector<1x4xf32> to vector<16x4xf32>
    %34 = arith.addf %32, %33 : vector<16x4xf32>
    %cst_29 = arith.constant 0.000000e+00 : f32
    %35 = vector.broadcast %cst_29 : f32 to vector<16x4xf32>
    %36 = arith.subf %35, %34 : vector<16x4xf32>
    %37 = math.exp %36 : vector<16x4xf32>
    %cst_30 = arith.constant 1.000000e+00 : f32
    %38 = vector.broadcast %cst_30 : f32 to vector<16x4xf32>
    %39 = arith.addf %38, %37 : vector<16x4xf32>
    %cst_31 = arith.constant 1.000000e+00 : f32
    %40 = vector.broadcast %cst_31 : f32 to vector<16x4xf32>
    %41 = arith.divf %40, %39 : vector<16x4xf32>
    %cst_32 = arith.constant dense<0.000000e+00> : vector<16x4xf32>
    %42 = tpu.matmul %31, %9, %cst_32 {dimension_numbers = #tpu.dot_dimension_numbers<[1], [0], [0], [1], [0, 0, 1, 1], [], []>} : vector<16x4xf32>, vector<4x4xf32>, vector<16x4xf32> -> vector<16x4xf32>
    %43 = vector.broadcast %10 : vector<1x4xf32> to vector<16x4xf32>
    %44 = arith.addf %42, %43 : vector<16x4xf32>
    %45 = arith.mulf %41, %44 : vector<16x4xf32>
    %46 = arith.addf %45, %13 : vector<16x4xf32>
    %cst_33 = arith.constant dense<0xFF800000> : vector<16xf32>
    %47 = vector.multi_reduction <maximumf>, %46, %cst_33 [1] : vector<16x4xf32> to vector<16xf32>
    %48 = vector.shape_cast %47 : vector<16xf32> to vector<16x1xf32>
    %49 = vector.broadcast %48 : vector<16x1xf32> to vector<16x4xf32>
    %50 = arith.subf %46, %49 : vector<16x4xf32>
    %51 = math.exp %50 : vector<16x4xf32>
    %cst_34 = arith.constant dense<0.000000e+00> : vector<16xf32>
    %52 = vector.multi_reduction <add>, %51, %cst_34 [1] : vector<16x4xf32> to vector<16xf32>
    %53 = vector.shape_cast %52 : vector<16xf32> to vector<16x1xf32>
    %54 = vector.broadcast %53 : vector<16x1xf32> to vector<16x4xf32>
    %55 = arith.divf %51, %54 : vector<16x4xf32>
    %c0_35 = arith.constant 0 : index
    %c0_36 = arith.constant 0 : index
    %56 = vector.load %arg23[%c0_35, %c0_36] : memref<16x4xf32, #tpu.memory_space<vmem>>, vector<16x4xf32>
    tpu.vector_store %arg23[%c0_35, %c0_36], %55 {strides = array<i32>} : memref<16x4xf32, #tpu.memory_space<vmem>>, vector<16x4xf32>,
    %c0_37 = arith.constant 0 : index
    %c0_38 = arith.constant 0 : index
    %c0_39 = arith.constant 0 : index
    %57 = vector.load %arg12[%c0_37, %c0_38, %c0_39] : memref<4x8x32xf32, #tpu.memory_space<vmem>>, vector<4x8x32xf32>
    %c0_40 = arith.constant 0 : index
    %c0_41 = arith.constant 0 : index
    %58 = vector.load %arg13[%c0_40, %c0_41] : memref<4x32xf32, #tpu.memory_space<vmem>>, vector<4x32xf32>
    %c0_42 = arith.constant 0 : index
    %c0_43 = arith.constant 0 : index
    %c0_44 = arith.constant 0 : index
    %59 = vector.load %arg14[%c0_42, %c0_43, %c0_44] : memref<4x8x32xf32, #tpu.memory_space<vmem>>, vector<4x8x32xf32>
    %c0_45 = arith.constant 0 : index
    %c0_46 = arith.constant 0 : index
    %60 = vector.load %arg15[%c0_45, %c0_46] : memref<4x32xf32, #tpu.memory_space<vmem>>, vector<4x32xf32>
    %c0_47 = arith.constant 0 : index
    %c0_48 = arith.constant 0 : index
    %c0_49 = arith.constant 0 : index
    %61 = vector.load %arg16[%c0_47, %c0_48, %c0_49] : memref<4x32x32xf32, #tpu.memory_space<vmem>>, vector<4x32x32xf32>
    %c0_50 = arith.constant 0 : index
    %c0_51 = arith.constant 0 : index
    %62 = vector.load %arg17[%c0_50, %c0_51] : memref<4x32xf32, #tpu.memory_space<vmem>>, vector<4x32xf32>
    %c0_52 = arith.constant 0 : index
    %c0_53 = arith.constant 0 : index
    %c0_54 = arith.constant 0 : index
    %63 = vector.load %arg18[%c0_52, %c0_53, %c0_54] : memref<4x32x32xf32, #tpu.memory_space<vmem>>, vector<4x32x32xf32>
    %c0_55 = arith.constant 0 : index
    %c0_56 = arith.constant 0 : index
    %64 = vector.load %arg19[%c0_55, %c0_56] : memref<4x32xf32, #tpu.memory_space<vmem>>, vector<4x32xf32>
    %c0_57 = arith.constant 0 : index
    %c0_58 = arith.constant 0 : index
    %c0_59 = arith.constant 0 : index
    %65 = vector.load %arg20[%c0_57, %c0_58, %c0_59] : memref<4x32x32xf32, #tpu.memory_space<vmem>>, vector<4x32x32xf32>
    %c0_60 = arith.constant 0 : index
    %c0_61 = arith.constant 0 : index
    %66 = vector.load %arg21[%c0_60, %c0_61] : memref<4x32xf32, #tpu.memory_space<vmem>>, vector<4x32xf32>
    %cst_62 = arith.constant 0.000000e+00 : f32
    %67 = vector.broadcast %cst_62 : f32 to vector<16x32xf32>
    %68 = vector.extract_strided_slice %0 {offsets = [0, 0], sizes = [16, 8], strides = [1, 1]} : vector<16x32xf32> to vector<16x8xf32>
    %69 = vector.extract_strided_slice %57 {offsets = [0, 0, 0], sizes = [1, 8, 32], strides = [1, 1, 1]} : vector<4x8x32xf32> to vector<1x8x32xf32>
    %70 = vector.shape_cast %69 : vector<1x8x32xf32> to vector<8x32xf32>
    %71 = vector.extract_strided_slice %58 {offsets = [0, 0], sizes = [1, 32], strides = [1, 1]} : vector<4x32xf32> to vector<1x32xf32>
    %72 = vector.extract_strided_slice %59 {offsets = [0, 0, 0], sizes = [1, 8, 32], strides = [1, 1, 1]} : vector<4x8x32xf32> to vector<1x8x32xf32>
    %73 = vector.shape_cast %72 : vector<1x8x32xf32> to vector<8x32xf32>
    %74 = vector.extract_strided_slice %60 {offsets = [0, 0], sizes = [1, 32], strides = [1, 1]} : vector<4x32xf32> to vector<1x32xf32>
    %75 = vector.extract_strided_slice %61 {offsets = [0, 0, 0], sizes = [1, 32, 32], strides = [1, 1, 1]} : vector<4x32x32xf32> to vector<1x32x32xf32>
    %76 = vector.shape_cast %75 : vector<1x32x32xf32> to vector<32x32xf32>
    %77 = vector.extract_strided_slice %62 {offsets = [0, 0], sizes = [1, 32], strides = [1, 1]} : vector<4x32xf32> to vector<1x32xf32>
    %78 = vector.extract_strided_slice %63 {offsets = [0, 0, 0], sizes = [1, 32, 32], strides = [1, 1, 1]} : vector<4x32x32xf32> to vector<1x32x32xf32>
    %79 = vector.shape_cast %78 : vector<1x32x32xf32> to vector<32x32xf32>
    %80 = vector.extract_strided_slice %64 {offsets = [0, 0], sizes = [1, 32], strides = [1, 1]} : vector<4x32xf32> to vector<1x32xf32>
    %81 = vector.extract_strided_slice %65 {offsets = [0, 0, 0], sizes = [1, 32, 32], strides = [1, 1, 1]} : vector<4x32x32xf32> to vector<1x32x32xf32>
    %82 = vector.shape_cast %81 : vector<1x32x32xf32> to vector<32x32xf32>
    %83 = vector.extract_strided_slice %66 {offsets = [0, 0], sizes = [1, 32], strides = [1, 1]} : vector<4x32xf32> to vector<1x32xf32>
    %cst_63 = arith.constant dense<0.000000e+00> : vector<16x32xf32>
    %84 = tpu.matmul %68, %70, %cst_63 {dimension_numbers = #tpu.dot_dimension_numbers<[1], [0], [0], [1], [0, 0, 1, 1], [], []>} : vector<16x8xf32>, vector<8x32xf32>, vector<16x32xf32> -> vector<16x32xf32>
    %85 = vector.broadcast %71 : vector<1x32xf32> to vector<16x32xf32>
    %86 = arith.addf %84, %85 : vector<16x32xf32>
    %cst_64 = arith.constant dense<0.000000e+00> : vector<16x32xf32>
    %87 = tpu.matmul %68, %73, %cst_64 {dimension_numbers = #tpu.dot_dimension_numbers<[1], [0], [0], [1], [0, 0, 1, 1], [], []>} : vector<16x8xf32>, vector<8x32xf32>, vector<16x32xf32> -> vector<16x32xf32>
    %88 = vector.broadcast %74 : vector<1x32xf32> to vector<16x32xf32>
    %89 = arith.addf %87, %88 : vector<16x32xf32>
    %cst_65 = arith.constant 0.000000e+00 : f32
    %90 = vector.broadcast %cst_65 : f32 to vector<16x32xf32>
    %91 = arith.cmpf ogt, %89, %90 : vector<16x32xf32>
    %cst_66 = arith.constant 0.000000e+00 : f32
    %92 = vector.broadcast %cst_66 : f32 to vector<16x32xf32>
    %93 = arith.minimumf %89, %92 : vector<16x32xf32>
    %94 = math.exp %93 : vector<16x32xf32>
    %cst_67 = arith.constant 1.000000e+00 : f32
    %95 = vector.broadcast %cst_67 : f32 to vector<16x32xf32>
    %96 = arith.subf %94, %95 : vector<16x32xf32>
    %cst_68 = arith.constant 1.67326319 : f32
    %97 = vector.broadcast %cst_68 : f32 to vector<16x32xf32>
    %98 = arith.mulf %97, %96 : vector<16x32xf32>
    %99 = arith.select %91, %89, %98 : vector<16x32xi1>, vector<16x32xf32>
    %cst_69 = arith.constant 1.05070102 : f32
    %100 = vector.broadcast %cst_69 : f32 to vector<16x32xf32>
    %101 = arith.mulf %100, %99 : vector<16x32xf32>
    %cst_70 = arith.constant dense<0.000000e+00> : vector<16x32xf32>
    %102 = tpu.matmul %101, %76, %cst_70 {dimension_numbers = #tpu.dot_dimension_numbers<[1], [0], [0], [1], [0, 0, 1, 1], [], []>} : vector<16x32xf32>, vector<32x32xf32>, vector<16x32xf32> -> vector<16x32xf32>
    %103 = vector.broadcast %77 : vector<1x32xf32> to vector<16x32xf32>
    %104 = arith.addf %102, %103 : vector<16x32xf32>
    %cst_71 = arith.constant dense<0.000000e+00> : vector<16x32xf32>
    %105 = tpu.matmul %104, %79, %cst_71 {dimension_numbers = #tpu.dot_dimension_numbers<[1], [0], [0], [1], [0, 0, 1, 1], [], []>} : vector<16x32xf32>, vector<32x32xf32>, vector<16x32xf32> -> vector<16x32xf32>
    %106 = vector.broadcast %80 : vector<1x32xf32> to vector<16x32xf32>
    %107 = arith.addf %105, %106 : vector<16x32xf32>
    %cst_72 = arith.constant 0.000000e+00 : f32
    %108 = vector.broadcast %cst_72 : f32 to vector<16x32xf32>
    %109 = arith.subf %108, %107 : vector<16x32xf32>
    %110 = math.exp %109 : vector<16x32xf32>
    %cst_73 = arith.constant 1.000000e+00 : f32
    %111 = vector.broadcast %cst_73 : f32 to vector<16x32xf32>
    %112 = arith.addf %111, %110 : vector<16x32xf32>
    %cst_74 = arith.constant 1.000000e+00 : f32
    %113 = vector.broadcast %cst_74 : f32 to vector<16x32xf32>
    %114 = arith.divf %113, %112 : vector<16x32xf32>
    %cst_75 = arith.constant dense<0.000000e+00> : vector<16x32xf32>
    %115 = tpu.matmul %104, %82, %cst_75 {dimension_numbers = #tpu.dot_dimension_numbers<[1], [0], [0], [1], [0, 0, 1, 1], [], []>} : vector<16x32xf32>, vector<32x32xf32>, vector<16x32xf32> -> vector<16x32xf32>
    %116 = vector.broadcast %83 : vector<1x32xf32> to vector<16x32xf32>
    %117 = arith.addf %115, %116 : vector<16x32xf32>
    %118 = arith.mulf %114, %117 : vector<16x32xf32>
    %119 = arith.addf %118, %86 : vector<16x32xf32>
    %120 = vector.extract_strided_slice %55 {offsets = [0, 0], sizes = [16, 1], strides = [1, 1]} : vector<16x4xf32> to vector<16x1xf32>
    %121 = vector.broadcast %120 : vector<16x1xf32> to vector<16x32xf32>
    %122 = arith.mulf %119, %121 : vector<16x32xf32>
    %123 = arith.addf %67, %122 : vector<16x32xf32>
    %124 = vector.extract_strided_slice %0 {offsets = [0, 8], sizes = [16, 8], strides = [1, 1]} : vector<16x32xf32> to vector<16x8xf32>
    %125 = vector.extract_strided_slice %57 {offsets = [1, 0, 0], sizes = [1, 8, 32], strides = [1, 1, 1]} : vector<4x8x32xf32> to vector<1x8x32xf32>
    %126 = vector.shape_cast %125 : vector<1x8x32xf32> to vector<8x32xf32>
    %127 = vector.extract_strided_slice %58 {offsets = [1, 0], sizes = [1, 32], strides = [1, 1]} : vector<4x32xf32> to vector<1x32xf32>
    %128 = vector.extract_strided_slice %59 {offsets = [1, 0, 0], sizes = [1, 8, 32], strides = [1, 1, 1]} : vector<4x8x32xf32> to vector<1x8x32xf32>
    %129 = vector.shape_cast %128 : vector<1x8x32xf32> to vector<8x32xf32>
    %130 = vector.extract_strided_slice %60 {offsets = [1, 0], sizes = [1, 32], strides = [1, 1]} : vector<4x32xf32> to vector<1x32xf32>
    %131 = vector.extract_strided_slice %61 {offsets = [1, 0, 0], sizes = [1, 32, 32], strides = [1, 1, 1]} : vector<4x32x32xf32> to vector<1x32x32xf32>
    %132 = vector.shape_cast %131 : vector<1x32x32xf32> to vector<32x32xf32>
    %133 = vector.extract_strided_slice %62 {offsets = [1, 0], sizes = [1, 32], strides = [1, 1]} : vector<4x32xf32> to vector<1x32xf32>
    %134 = vector.extract_strided_slice %63 {offsets = [1, 0, 0], sizes = [1, 32, 32], strides = [1, 1, 1]} : vector<4x32x32xf32> to vector<1x32x32xf32>
    %135 = vector.shape_cast %134 : vector<1x32x32xf32> to vector<32x32xf32>
    %136 = vector.extract_strided_slice %64 {offsets = [1, 0], sizes = [1, 32], strides = [1, 1]} : vector<4x32xf32> to vector<1x32xf32>
    %137 = vector.extract_strided_slice %65 {offsets = [1, 0, 0], sizes = [1, 32, 32], strides = [1, 1, 1]} : vector<4x32x32xf32> to vector<1x32x32xf32>
    %138 = vector.shape_cast %137 : vector<1x32x32xf32> to vector<32x32xf32>
    %139 = vector.extract_strided_slice %66 {offsets = [1, 0], sizes = [1, 32], strides = [1, 1]} : vector<4x32xf32> to vector<1x32xf32>
    %cst_76 = arith.constant dense<0.000000e+00> : vector<16x32xf32>
    %140 = tpu.matmul %124, %126, %cst_76 {dimension_numbers = #tpu.dot_dimension_numbers<[1], [0], [0], [1], [0, 0, 1, 1], [], []>} : vector<16x8xf32>, vector<8x32xf32>, vector<16x32xf32> -> vector<16x32xf32>
    %141 = vector.broadcast %127 : vector<1x32xf32> to vector<16x32xf32>
    %142 = arith.addf %140, %141 : vector<16x32xf32>
    %cst_77 = arith.constant dense<0.000000e+00> : vector<16x32xf32>
    %143 = tpu.matmul %124, %129, %cst_77 {dimension_numbers = #tpu.dot_dimension_numbers<[1], [0], [0], [1], [0, 0, 1, 1], [], []>} : vector<16x8xf32>, vector<8x32xf32>, vector<16x32xf32> -> vector<16x32xf32>
    %144 = vector.broadcast %130 : vector<1x32xf32> to vector<16x32xf32>
    %145 = arith.addf %143, %144 : vector<16x32xf32>
    %cst_78 = arith.constant 0.000000e+00 : f32
    %146 = vector.broadcast %cst_78 : f32 to vector<16x32xf32>
    %147 = arith.cmpf ogt, %145, %146 : vector<16x32xf32>
    %cst_79 = arith.constant 0.000000e+00 : f32
    %148 = vector.broadcast %cst_79 : f32 to vector<16x32xf32>
    %149 = arith.minimumf %145, %148 : vector<16x32xf32>
    %150 = math.exp %149 : vector<16x32xf32>
    %cst_80 = arith.constant 1.000000e+00 : f32
    %151 = vector.broadcast %cst_80 : f32 to vector<16x32xf32>
    %152 = arith.subf %150, %151 : vector<16x32xf32>
    %cst_81 = arith.constant 1.67326319 : f32
    %153 = vector.broadcast %cst_81 : f32 to vector<16x32xf32>
    %154 = arith.mulf %153, %152 : vector<16x32xf32>
    %155 = arith.select %147, %145, %154 : vector<16x32xi1>, vector<16x32xf32>
    %cst_82 = arith.constant 1.05070102 : f32
    %156 = vector.broadcast %cst_82 : f32 to vector<16x32xf32>
    %157 = arith.mulf %156, %155 : vector<16x32xf32>
    %cst_83 = arith.constant dense<0.000000e+00> : vector<16x32xf32>
    %158 = tpu.matmul %157, %132, %cst_83 {dimension_numbers = #tpu.dot_dimension_numbers<[1], [0], [0], [1], [0, 0, 1, 1], [], []>} : vector<16x32xf32>, vector<32x32xf32>, vector<16x32xf32> -> vector<16x32xf32>
    %159 = vector.broadcast %133 : vector<1x32xf32> to vector<16x32xf32>
    %160 = arith.addf %158, %159 : vector<16x32xf32>
    %cst_84 = arith.constant dense<0.000000e+00> : vector<16x32xf32>
    %161 = tpu.matmul %160, %135, %cst_84 {dimension_numbers = #tpu.dot_dimension_numbers<[1], [0], [0], [1], [0, 0, 1, 1], [], []>} : vector<16x32xf32>, vector<32x32xf32>, vector<16x32xf32> -> vector<16x32xf32>
    %162 = vector.broadcast %136 : vector<1x32xf32> to vector<16x32xf32>
    %163 = arith.addf %161, %162 : vector<16x32xf32>
    %cst_85 = arith.constant 0.000000e+00 : f32
    %164 = vector.broadcast %cst_85 : f32 to vector<16x32xf32>
    %165 = arith.subf %164, %163 : vector<16x32xf32>
    %166 = math.exp %165 : vector<16x32xf32>
    %cst_86 = arith.constant 1.000000e+00 : f32
    %167 = vector.broadcast %cst_86 : f32 to vector<16x32xf32>
    %168 = arith.addf %167, %166 : vector<16x32xf32>
    %cst_87 = arith.constant 1.000000e+00 : f32
    %169 = vector.broadcast %cst_87 : f32 to vector<16x32xf32>
    %170 = arith.divf %169, %168 : vector<16x32xf32>
    %cst_88 = arith.constant dense<0.000000e+00> : vector<16x32xf32>
    %171 = tpu.matmul %160, %138, %cst_88 {dimension_numbers = #tpu.dot_dimension_numbers<[1], [0], [0], [1], [0, 0, 1, 1], [], []>} : vector<16x32xf32>, vector<32x32xf32>, vector<16x32xf32> -> vector<16x32xf32>
    %172 = vector.broadcast %139 : vector<1x32xf32> to vector<16x32xf32>
    %173 = arith.addf %171, %172 : vector<16x32xf32>
    %174 = arith.mulf %170, %173 : vector<16x32xf32>
    %175 = arith.addf %174, %142 : vector<16x32xf32>
    %176 = vector.extract_strided_slice %55 {offsets = [0, 1], sizes = [16, 1], strides = [1, 1]} : vector<16x4xf32> to vector<16x1xf32>
    %177 = vector.broadcast %176 : vector<16x1xf32> to vector<16x32xf32>
    %178 = arith.mulf %175, %177 : vector<16x32xf32>
    %179 = arith.addf %123, %178 : vector<16x32xf32>
    %180 = vector.extract_strided_slice %0 {offsets = [0, 16], sizes = [16, 8], strides = [1, 1]} : vector<16x32xf32> to vector<16x8xf32>
    %181 = vector.extract_strided_slice %57 {offsets = [2, 0, 0], sizes = [1, 8, 32], strides = [1, 1, 1]} : vector<4x8x32xf32> to vector<1x8x32xf32>
    %182 = vector.shape_cast %181 : vector<1x8x32xf32> to vector<8x32xf32>
    %183 = vector.extract_strided_slice %58 {offsets = [2, 0], sizes = [1, 32], strides = [1, 1]} : vector<4x32xf32> to vector<1x32xf32>
    %184 = vector.extract_strided_slice %59 {offsets = [2, 0, 0], sizes = [1, 8, 32], strides = [1, 1, 1]} : vector<4x8x32xf32> to vector<1x8x32xf32>
    %185 = vector.shape_cast %184 : vector<1x8x32xf32> to vector<8x32xf32>
    %186 = vector.extract_strided_slice %60 {offsets = [2, 0], sizes = [1, 32], strides = [1, 1]} : vector<4x32xf32> to vector<1x32xf32>
    %187 = vector.extract_strided_slice %61 {offsets = [2, 0, 0], sizes = [1, 32, 32], strides = [1, 1, 1]} : vector<4x32x32xf32> to vector<1x32x32xf32>
    %188 = vector.shape_cast %187 : vector<1x32x32xf32> to vector<32x32xf32>
    %189 = vector.extract_strided_slice %62 {offsets = [2, 0], sizes = [1, 32], strides = [1, 1]} : vector<4x32xf32> to vector<1x32xf32>
    %190 = vector.extract_strided_slice %63 {offsets = [2, 0, 0], sizes = [1, 32, 32], strides = [1, 1, 1]} : vector<4x32x32xf32> to vector<1x32x32xf32>
    %191 = vector.shape_cast %190 : vector<1x32x32xf32> to vector<32x32xf32>
    %192 = vector.extract_strided_slice %64 {offsets = [2, 0], sizes = [1, 32], strides = [1, 1]} : vector<4x32xf32> to vector<1x32xf32>
    %193 = vector.extract_strided_slice %65 {offsets = [2, 0, 0], sizes = [1, 32, 32], strides = [1, 1, 1]} : vector<4x32x32xf32> to vector<1x32x32xf32>
    %194 = vector.shape_cast %193 : vector<1x32x32xf32> to vector<32x32xf32>
    %195 = vector.extract_strided_slice %66 {offsets = [2, 0], sizes = [1, 32], strides = [1, 1]} : vector<4x32xf32> to vector<1x32xf32>
    %cst_89 = arith.constant dense<0.000000e+00> : vector<16x32xf32>
    %196 = tpu.matmul %180, %182, %cst_89 {dimension_numbers = #tpu.dot_dimension_numbers<[1], [0], [0], [1], [0, 0, 1, 1], [], []>} : vector<16x8xf32>, vector<8x32xf32>, vector<16x32xf32> -> vector<16x32xf32>
    %197 = vector.broadcast %183 : vector<1x32xf32> to vector<16x32xf32>
    %198 = arith.addf %196, %197 : vector<16x32xf32>
    %cst_90 = arith.constant dense<0.000000e+00> : vector<16x32xf32>
    %199 = tpu.matmul %180, %185, %cst_90 {dimension_numbers = #tpu.dot_dimension_numbers<[1], [0], [0], [1], [0, 0, 1, 1], [], []>} : vector<16x8xf32>, vector<8x32xf32>, vector<16x32xf32> -> vector<16x32xf32>
    %200 = vector.broadcast %186 : vector<1x32xf32> to vector<16x32xf32>
    %201 = arith.addf %199, %200 : vector<16x32xf32>
    %cst_91 = arith.constant 0.000000e+00 : f32
    %202 = vector.broadcast %cst_91 : f32 to vector<16x32xf32>
    %203 = arith.cmpf ogt, %201, %202 : vector<16x32xf32>
    %cst_92 = arith.constant 0.000000e+00 : f32
    %204 = vector.broadcast %cst_92 : f32 to vector<16x32xf32>
    %205 = arith.minimumf %201, %204 : vector<16x32xf32>
    %206 = math.exp %205 : vector<16x32xf32>
    %cst_93 = arith.constant 1.000000e+00 : f32
    %207 = vector.broadcast %cst_93 : f32 to vector<16x32xf32>
    %208 = arith.subf %206, %207 : vector<16x32xf32>
    %cst_94 = arith.constant 1.67326319 : f32
    %209 = vector.broadcast %cst_94 : f32 to vector<16x32xf32>
    %210 = arith.mulf %209, %208 : vector<16x32xf32>
    %211 = arith.select %203, %201, %210 : vector<16x32xi1>, vector<16x32xf32>
    %cst_95 = arith.constant 1.05070102 : f32
    %212 = vector.broadcast %cst_95 : f32 to vector<16x32xf32>
    %213 = arith.mulf %212, %211 : vector<16x32xf32>
    %cst_96 = arith.constant dense<0.000000e+00> : vector<16x32xf32>
    %214 = tpu.matmul %213, %188, %cst_96 {dimension_numbers = #tpu.dot_dimension_numbers<[1], [0], [0], [1], [0, 0, 1, 1], [], []>} : vector<16x32xf32>, vector<32x32xf32>, vector<16x32xf32> -> vector<16x32xf32>
    %215 = vector.broadcast %189 : vector<1x32xf32> to vector<16x32xf32>
    %216 = arith.addf %214, %215 : vector<16x32xf32>
    %cst_97 = arith.constant dense<0.000000e+00> : vector<16x32xf32>
    %217 = tpu.matmul %216, %191, %cst_97 {dimension_numbers = #tpu.dot_dimension_numbers<[1], [0], [0], [1], [0, 0, 1, 1], [], []>} : vector<16x32xf32>, vector<32x32xf32>, vector<16x32xf32> -> vector<16x32xf32>
    %218 = vector.broadcast %192 : vector<1x32xf32> to vector<16x32xf32>
    %219 = arith.addf %217, %218 : vector<16x32xf32>
    %cst_98 = arith.constant 0.000000e+00 : f32
    %220 = vector.broadcast %cst_98 : f32 to vector<16x32xf32>
    %221 = arith.subf %220, %219 : vector<16x32xf32>
    %222 = math.exp %221 : vector<16x32xf32>
    %cst_99 = arith.constant 1.000000e+00 : f32
    %223 = vector.broadcast %cst_99 : f32 to vector<16x32xf32>
    %224 = arith.addf %223, %222 : vector<16x32xf32>
    %cst_100 = arith.constant 1.000000e+00 : f32
    %225 = vector.broadcast %cst_100 : f32 to vector<16x32xf32>
    %226 = arith.divf %225, %224 : vector<16x32xf32>
    %cst_101 = arith.constant dense<0.000000e+00> : vector<16x32xf32>
    %227 = tpu.matmul %216, %194, %cst_101 {dimension_numbers = #tpu.dot_dimension_numbers<[1], [0], [0], [1], [0, 0, 1, 1], [], []>} : vector<16x32xf32>, vector<32x32xf32>, vector<16x32xf32> -> vector<16x32xf32>
    %228 = vector.broadcast %195 : vector<1x32xf32> to vector<16x32xf32>
    %229 = arith.addf %227, %228 : vector<16x32xf32>
    %230 = arith.mulf %226, %229 : vector<16x32xf32>
    %231 = arith.addf %230, %198 : vector<16x32xf32>
    %232 = vector.extract_strided_slice %55 {offsets = [0, 2], sizes = [16, 1], strides = [1, 1]} : vector<16x4xf32> to vector<16x1xf32>
    %233 = vector.broadcast %232 : vector<16x1xf32> to vector<16x32xf32>
    %234 = arith.mulf %231, %233 : vector<16x32xf32>
    %235 = arith.addf %179, %234 : vector<16x32xf32>
    %236 = vector.extract_strided_slice %0 {offsets = [0, 24], sizes = [16, 8], strides = [1, 1]} : vector<16x32xf32> to vector<16x8xf32>
    %237 = vector.extract_strided_slice %57 {offsets = [3, 0, 0], sizes = [1, 8, 32], strides = [1, 1, 1]} : vector<4x8x32xf32> to vector<1x8x32xf32>
    %238 = vector.shape_cast %237 : vector<1x8x32xf32> to vector<8x32xf32>
    %239 = vector.extract_strided_slice %58 {offsets = [3, 0], sizes = [1, 32], strides = [1, 1]} : vector<4x32xf32> to vector<1x32xf32>
    %240 = vector.extract_strided_slice %59 {offsets = [3, 0, 0], sizes = [1, 8, 32], strides = [1, 1, 1]} : vector<4x8x32xf32> to vector<1x8x32xf32>
    %241 = vector.shape_cast %240 : vector<1x8x32xf32> to vector<8x32xf32>
    %242 = vector.extract_strided_slice %60 {offsets = [3, 0], sizes = [1, 32], strides = [1, 1]} : vector<4x32xf32> to vector<1x32xf32>
    %243 = vector.extract_strided_slice %61 {offsets = [3, 0, 0], sizes = [1, 32, 32], strides = [1, 1, 1]} : vector<4x32x32xf32> to vector<1x32x32xf32>
    %244 = vector.shape_cast %243 : vector<1x32x32xf32> to vector<32x32xf32>
    %245 = vector.extract_strided_slice %62 {offsets = [3, 0], sizes = [1, 32], strides = [1, 1]} : vector<4x32xf32> to vector<1x32xf32>
    %246 = vector.extract_strided_slice %63 {offsets = [3, 0, 0], sizes = [1, 32, 32], strides = [1, 1, 1]} : vector<4x32x32xf32> to vector<1x32x32xf32>
    %247 = vector.shape_cast %246 : vector<1x32x32xf32> to vector<32x32xf32>
    %248 = vector.extract_strided_slice %64 {offsets = [3, 0], sizes = [1, 32], strides = [1, 1]} : vector<4x32xf32> to vector<1x32xf32>
    %249 = vector.extract_strided_slice %65 {offsets = [3, 0, 0], sizes = [1, 32, 32], strides = [1, 1, 1]} : vector<4x32x32xf32> to vector<1x32x32xf32>
    %250 = vector.shape_cast %249 : vector<1x32x32xf32> to vector<32x32xf32>
    %251 = vector.extract_strided_slice %66 {offsets = [3, 0], sizes = [1, 32], strides = [1, 1]} : vector<4x32xf32> to vector<1x32xf32>
    %cst_102 = arith.constant dense<0.000000e+00> : vector<16x32xf32>
    %252 = tpu.matmul %236, %238, %cst_102 {dimension_numbers = #tpu.dot_dimension_numbers<[1], [0], [0], [1], [0, 0, 1, 1], [], []>} : vector<16x8xf32>, vector<8x32xf32>, vector<16x32xf32> -> vector<16x32xf32>
    %253 = vector.broadcast %239 : vector<1x32xf32> to vector<16x32xf32>
    %254 = arith.addf %252, %253 : vector<16x32xf32>
    %cst_103 = arith.constant dense<0.000000e+00> : vector<16x32xf32>
    %255 = tpu.matmul %236, %241, %cst_103 {dimension_numbers = #tpu.dot_dimension_numbers<[1], [0], [0], [1], [0, 0, 1, 1], [], []>} : vector<16x8xf32>, vector<8x32xf32>, vector<16x32xf32> -> vector<16x32xf32>
    %256 = vector.broadcast %242 : vector<1x32xf32> to vector<16x32xf32>
    %257 = arith.addf %255, %256 : vector<16x32xf32>
    %cst_104 = arith.constant 0.000000e+00 : f32
    %258 = vector.broadcast %cst_104 : f32 to vector<16x32xf32>
    %259 = arith.cmpf ogt, %257, %258 : vector<16x32xf32>
    %cst_105 = arith.constant 0.000000e+00 : f32
    %260 = vector.broadcast %cst_105 : f32 to vector<16x32xf32>
    %261 = arith.minimumf %257, %260 : vector<16x32xf32>
    %262 = math.exp %261 : vector<16x32xf32>
    %cst_106 = arith.constant 1.000000e+00 : f32
    %263 = vector.broadcast %cst_106 : f32 to vector<16x32xf32>
    %264 = arith.subf %262, %263 : vector<16x32xf32>
    %cst_107 = arith.constant 1.67326319 : f32
    %265 = vector.broadcast %cst_107 : f32 to vector<16x32xf32>
    %266 = arith.mulf %265, %264 : vector<16x32xf32>
    %267 = arith.select %259, %257, %266 : vector<16x32xi1>, vector<16x32xf32>
    %cst_108 = arith.constant 1.05070102 : f32
    %268 = vector.broadcast %cst_108 : f32 to vector<16x32xf32>
    %269 = arith.mulf %268, %267 : vector<16x32xf32>
    %cst_109 = arith.constant dense<0.000000e+00> : vector<16x32xf32>
    %270 = tpu.matmul %269, %244, %cst_109 {dimension_numbers = #tpu.dot_dimension_numbers<[1], [0], [0], [1], [0, 0, 1, 1], [], []>} : vector<16x32xf32>, vector<32x32xf32>, vector<16x32xf32> -> vector<16x32xf32>
    %271 = vector.broadcast %245 : vector<1x32xf32> to vector<16x32xf32>
    %272 = arith.addf %270, %271 : vector<16x32xf32>
    %cst_110 = arith.constant dense<0.000000e+00> : vector<16x32xf32>
    %273 = tpu.matmul %272, %247, %cst_110 {dimension_numbers = #tpu.dot_dimension_numbers<[1], [0], [0], [1], [0, 0, 1, 1], [], []>} : vector<16x32xf32>, vector<32x32xf32>, vector<16x32xf32> -> vector<16x32xf32>
    %274 = vector.broadcast %248 : vector<1x32xf32> to vector<16x32xf32>
    %275 = arith.addf %273, %274 : vector<16x32xf32>
    %cst_111 = arith.constant 0.000000e+00 : f32
    %276 = vector.broadcast %cst_111 : f32 to vector<16x32xf32>
    %277 = arith.subf %276, %275 : vector<16x32xf32>
    %278 = math.exp %277 : vector<16x32xf32>
    %cst_112 = arith.constant 1.000000e+00 : f32
    %279 = vector.broadcast %cst_112 : f32 to vector<16x32xf32>
    %280 = arith.addf %279, %278 : vector<16x32xf32>
    %cst_113 = arith.constant 1.000000e+00 : f32
    %281 = vector.broadcast %cst_113 : f32 to vector<16x32xf32>
    %282 = arith.divf %281, %280 : vector<16x32xf32>
    %cst_114 = arith.constant dense<0.000000e+00> : vector<16x32xf32>
    %283 = tpu.matmul %272, %250, %cst_114 {dimension_numbers = #tpu.dot_dimension_numbers<[1], [0], [0], [1], [0, 0, 1, 1], [], []>} : vector<16x32xf32>, vector<32x32xf32>, vector<16x32xf32> -> vector<16x32xf32>
    %284 = vector.broadcast %251 : vector<1x32xf32> to vector<16x32xf32>
    %285 = arith.addf %283, %284 : vector<16x32xf32>
    %286 = arith.mulf %282, %285 : vector<16x32xf32>
    %287 = arith.addf %286, %254 : vector<16x32xf32>
    %288 = vector.extract_strided_slice %55 {offsets = [0, 3], sizes = [16, 1], strides = [1, 1]} : vector<16x4xf32> to vector<16x1xf32>
    %289 = vector.broadcast %288 : vector<16x1xf32> to vector<16x32xf32>
    %290 = arith.mulf %287, %289 : vector<16x32xf32>
    %291 = arith.addf %235, %290 : vector<16x32xf32>
    %c0_115 = arith.constant 0 : index
    %c0_116 = arith.constant 0 : index
    %292 = vector.load %arg22[%c0_115, %c0_116] : memref<16x32xf32, #tpu.memory_space<vmem>>, vector<16x32xf32>
    tpu.vector_store %arg22[%c0_115, %c0_116], %291 {strides = array<i32>} : memref<16x32xf32, #tpu.memory_space<vmem>>, vector<16x32xf32>,
    return
  }
  func.func @transform_0(%arg0: i32) -> (i32, i32) {
    %c0_i32 = arith.constant 0 : i32
    %c0_i32_0 = arith.constant 0 : i32
    return %arg0, %c0_i32 : i32, i32
  }
  func.func @transform_1(%arg0: i32) -> (i32, i32) {
    %c0_i32 = arith.constant 0 : i32
    %c0_i32_0 = arith.constant 0 : i32
    %c0_i32_1 = arith.constant 0 : i32
    return %c0_i32, %c0_i32_0 : i32, i32
  }
  func.func @transform_2(%arg0: i32) -> (i32, i32) {
    %c0_i32 = arith.constant 0 : i32
    %c0_i32_0 = arith.constant 0 : i32
    %c0_i32_1 = arith.constant 0 : i32
    return %c0_i32, %c0_i32_0 : i32, i32
  }
  func.func @transform_3(%arg0: i32) -> (i32, i32) {
    %c0_i32 = arith.constant 0 : i32
    %c0_i32_0 = arith.constant 0 : i32
    %c0_i32_1 = arith.constant 0 : i32
    return %c0_i32, %c0_i32_0 : i32, i32
  }
  func.func @transform_4(%arg0: i32) -> (i32, i32) {
    %c0_i32 = arith.constant 0 : i32
    %c0_i32_0 = arith.constant 0 : i32
    %c0_i32_1 = arith.constant 0 : i32
    return %c0_i32, %c0_i32_0 : i32, i32
  }
  func.func @transform_5(%arg0: i32) -> (i32, i32) {
    %c0_i32 = arith.constant 0 : i32
    %c0_i32_0 = arith.constant 0 : i32
    %c0_i32_1 = arith.constant 0 : i32
    return %c0_i32, %c0_i32_0 : i32, i32
  }
  func.func @transform_6(%arg0: i32) -> (i32, i32) {
    %c0_i32 = arith.constant 0 : i32
    %c0_i32_0 = arith.constant 0 : i32
    %c0_i32_1 = arith.constant 0 : i32
    return %c0_i32, %c0_i32_0 : i32, i32
  }
  func.func @transform_7(%arg0: i32) -> (i32, i32) {
    %c0_i32 = arith.constant 0 : i32
    %c0_i32_0 = arith.constant 0 : i32
    %c0_i32_1 = arith.constant 0 : i32
    return %c0_i32, %c0_i32_0 : i32, i32
  }
  func.func @transform_8(%arg0: i32) -> (i32, i32) {
    %c0_i32 = arith.constant 0 : i32
    %c0_i32_0 = arith.constant 0 : i32
    %c0_i32_1 = arith.constant 0 : i32
    return %c0_i32, %c0_i32_0 : i32, i32
  }
  func.func @transform_9(%arg0: i32) -> (i32, i32) {
    %c0_i32 = arith.constant 0 : i32
    %c0_i32_0 = arith.constant 0 : i32
    %c0_i32_1 = arith.constant 0 : i32
    return %c0_i32, %c0_i32_0 : i32, i32
  }
  func.func @transform_10(%arg0: i32) -> (i32, i32) {
    %c0_i32 = arith.constant 0 : i32
    %c0_i32_0 = arith.constant 0 : i32
    %c0_i32_1 = arith.constant 0 : i32
    return %c0_i32, %c0_i32_0 : i32, i32
  }
  func.func @transform_11(%arg0: i32) -> (i32, i32, i32) {
    %c0_i32 = arith.constant 0 : i32
    %c0_i32_0 = arith.constant 0 : i32
    %c0_i32_1 = arith.constant 0 : i32
    %c0_i32_2 = arith.constant 0 : i32
    return %c0_i32, %c0_i32_0, %c0_i32_1 : i32, i32, i32
  }
  func.func @transform_12(%arg0: i32) -> (i32, i32) {
    %c0_i32 = arith.constant 0 : i32
    %c0_i32_0 = arith.constant 0 : i32
    %c0_i32_1 = arith.constant 0 : i32
    return %c0_i32, %c0_i32_0 : i32, i32
  }
  func.func @transform_13(%arg0: i32) -> (i32, i32, i32) {
    %c0_i32 = arith.constant 0 : i32
    %c0_i32_0 = arith.constant 0 : i32
    %c0_i32_1 = arith.constant 0 : i32
    %c0_i32_2 = arith.constant 0 : i32
    return %c0_i32, %c0_i32_0, %c0_i32_1 : i32, i32, i32
  }
  func.func @transform_14(%arg0: i32) -> (i32, i32) {
    %c0_i32 = arith.constant 0 : i32
    %c0_i32_0 = arith.constant 0 : i32
    %c0_i32_1 = arith.constant 0 : i32
    return %c0_i32, %c0_i32_0 : i32, i32
  }
  func.func @transform_15(%arg0: i32) -> (i32, i32, i32) {
    %c0_i32 = arith.constant 0 : i32
    %c0_i32_0 = arith.constant 0 : i32
    %c0_i32_1 = arith.constant 0 : i32
    %c0_i32_2 = arith.constant 0 : i32
    return %c0_i32, %c0_i32_0, %c0_i32_1 : i32, i32, i32
  }
  func.func @transform_16(%arg0: i32) -> (i32, i32) {
    %c0_i32 = arith.constant 0 : i32
    %c0_i32_0 = arith.constant 0 : i32
    %c0_i32_1 = arith.constant 0 : i32
    return %c0_i32, %c0_i32_0 : i32, i32
  }
  func.func @transform_17(%arg0: i32) -> (i32, i32, i32) {
    %c0_i32 = arith.constant 0 : i32
    %c0_i32_0 = arith.constant 0 : i32
    %c0_i32_1 = arith.constant 0 : i32
    %c0_i32_2 = arith.constant 0 : i32
    return %c0_i32, %c0_i32_0, %c0_i32_1 : i32, i32, i32
  }
  func.func @transform_18(%arg0: i32) -> (i32, i32) {
    %c0_i32 = arith.constant 0 : i32
    %c0_i32_0 = arith.constant 0 : i32
    %c0_i32_1 = arith.constant 0 : i32
    return %c0_i32, %c0_i32_0 : i32, i32
  }
  func.func @transform_19(%arg0: i32) -> (i32, i32, i32) {
    %c0_i32 = arith.constant 0 : i32
    %c0_i32_0 = arith.constant 0 : i32
    %c0_i32_1 = arith.constant 0 : i32
    %c0_i32_2 = arith.constant 0 : i32
    return %c0_i32, %c0_i32_0, %c0_i32_1 : i32, i32, i32
  }
  func.func @transform_20(%arg0: i32) -> (i32, i32) {
    %c0_i32 = arith.constant 0 : i32
    %c0_i32_0 = arith.constant 0 : i32
    %c0_i32_1 = arith.constant 0 : i32
    return %c0_i32, %c0_i32_0 : i32, i32
  }
  func.func @transform_21(%arg0: i32) -> (i32, i32) {
    %c0_i32 = arith.constant 0 : i32
    %c0_i32_0 = arith.constant 0 : i32
    return %arg0, %c0_i32 : i32, i32
  }
  func.func @transform_22(%arg0: i32) -> (i32, i32) {
    %c0_i32 = arith.constant 0 : i32
    %c0_i32_0 = arith.constant 0 : i32
    return %arg0, %c0_i32 : i32, i32
  }
}

</mosaic_0001>

<bundles_post_ra>
// kernel: tpu_custom_call.1
= control target key start
LH: loop header
LB: loop body
LE: loop exit
PB: predicated region body
PF: predicated region fallthrough
CT: control target
= control target key end

     0   :  { %s2385_s0 = inlined_call_operand.hbm [shape: f32[16,32], index: 0, kind: input, shape index: {}]   ;;  %s2386_s1 = inlined_call_operand.vmem [shape: f32[32,4], index: 1, kind: input, shape index: {}]   ;;  %s2387_s2 = inlined_call_operand.hbm [shape: f32[1,4], index: 2, kind: input, shape index: {}]   ;;  %s2388_s3 = inlined_call_operand.vmem [shape: f32[32,32], index: 3, kind: input, shape index: {}]   ;;  %s2389_s4 = inlined_call_operand.hbm [shape: f32[1,32], index: 4, kind: input, shape index: {}]   ;;  %s2390_s5 = inlined_call_operand.vmem [shape: f32[32,4], index: 5, kind: input, shape index: {}]   ;;  %s2391_s6 = inlined_call_operand.hbm [shape: f32[1,4], index: 6, kind: input, shape index: {}]   ;;  %s2392_s7 = inlined_call_operand.vmem [shape: f32[4,4], index: 7, kind: input, shape index: {}]   ;;  %s2393_s8 = inlined_call_operand.hbm [shape: f32[1,4], index: 8, kind: input, shape index: {}]   ;;  %s2394_s9 = inlined_call_operand.vmem [shape: f32[4,4], index: 9, kind: input, shape index: {}]   ;;  %s2395_s10 = inlined_call_operand.hbm [shape: f32[1,4], index: 10, kind: input, shape index: {}]   ;;  %s2396_s11 = inlined_call_operand.vmem [shape: f32[4,8,32], index: 11, kind: input, shape index: {}]   ;;  %s2397_s12 = inlined_call_operand.vmem [shape: f32[4,32], index: 12, kind: input, shape index: {}]   ;;  %s2398_s13 = inlined_call_operand.hbm [shape: f32[4,8,32], index: 13, kind: input, shape index: {}]   ;;  %s2399_s14 = inlined_call_operand.vmem [shape: f32[4,32], index: 14, kind: input, shape index: {}]   ;;  %s2400_s15 = inlined_call_operand.hbm [shape: f32[4,32,32], index: 15, kind: input, shape index: {}]   ;;  %s2401_s16 = inlined_call_operand.hbm [shape: f32[4,32], index: 16, kind: input, shape index: {}]   ;;  %s2402_s17 = inlined_call_operand.hbm [shape: f32[4,32,32], index: 17, kind: input, shape index: {}]   ;;  %s2403_s18 = inlined_call_operand.vmem [shape: f32[4,32], index: 18, kind: input, shape index: {}]   ;;  %s2404_s19 = inlined_call_operand.hbm [shape: f32[4,32,32], index: 19, kind: input, shape index: {}]   ;;  %s2405_s20 = inlined_call_operand.hbm [shape: f32[4,32], index: 20, kind: input, shape index: {}]   ;;  %s2406_s21 = inlined_call_operand.hbm [shape: f32[16,32], index: 21, kind: output, shape index: {0}]   ;;  %s2407_s22 = inlined_call_operand.vmem [shape: f32[16,4], index: 22, kind: output, shape index: {1}]  }
   0x1   :  { %2411 = sst [smem:[#allocation31_spill]] %s2385_s0 }
   0x2   :  { %2412 = sst [smem:[#allocation32_spill]] %s2386_s1 }
   0x3   :  { %2413 = sst [smem:[#allocation33_spill]] %s2387_s2 }
   0x4   :  { %2414 = sst [smem:[#allocation34_spill]] %s2388_s3 }
   0x5   :  { %2415 = sst [smem:[#allocation35_spill]] %s2389_s4 }
   0x6   :  { %2416 = sst [smem:[#allocation36_spill]] %s2390_s5 }
   0x7   :  { %2417 = sst [smem:[#allocation37_spill]] %s2391_s6 }
   0x8   :  { %2418 = sst [smem:[#allocation38_spill]] %s2406_s21 }
   0x9   :  { %28 = vsyncpa [#allocation3], 0 }
   0xa   :  { %29 = vsyncpa [#allocation6], 0 }
   0xb   :  { %30 = vsyncpa [#allocation9], 0 }
   0xc   :  { %31 = vsyncpa [#allocation12], 0 }
   0xd   :  { %32 = vsyncpa [#allocation15], 0 }
   0xe   :  { %33 = vsyncpa [#allocation18], 0 }
   0xf   :  { %34 = vsyncpa [#allocation21], 0  ;;  %s2419_s29 = sld [smem:[#allocation33_spill]] }
  0x15   :  { %s56_s30 = sshll.u32 %s2419_s29, 4  ;;  %s57_s30 = int_to_ptr.hbm [resolvable:$true] %s56_s30 }
  0x16   :  { %35 = vsyncpa [#allocation4], 0  ;;  %s1955_s4 = smov [#allocation5]   ;;  %s2420_s5 = sld [smem:[#allocation37_spill]] }
  0x17   :  { %s58_s0 = sshll.u32 %s1955_s4, 4  ;;  %s1956_s6 = smov [#allocation8]   ;;  %s59_s0 = int_to_ptr.vmem [resolvable:$true] %s58_s0 }
  0x18   :  { %61 = dma.hbm_to_vmem [thread:$0]  %s57_s30, 16, %s59_s0, [#allocation6]  }
  0x19   :  { %s84_s25 = sshll.u32 %s1956_s6, 4  ;;  %s108_s27 = sshll.u32 %s2395_s10, 4  ;;  %s85_s25 = int_to_ptr.vmem [resolvable:$true] %s84_s25  ;;  %s109_s27 = int_to_ptr.hbm [resolvable:$true] %s108_s27 }
  0x1a   :  { %s1957_s3 = smov [#allocation11]   ;;  %s137_s21 = sshll.u32 %s2400_s15, 4  ;;  %s138_s21 = int_to_ptr.hbm [resolvable:$true] %s137_s21 }
  0x1b   :  { %s110_s28 = sshll.u32 %s1957_s3, 4  ;;  %s1958_s30 = smov [#allocation14]   ;;  %s111_s28 = int_to_ptr.vmem [resolvable:$true] %s110_s28 }
  0x1c   :  { %s82_s24 = sshll.u32 %s2420_s5, 4  ;;  %s139_s0 = sshll.u32 %s1958_s30, 4  ;;  %s83_s24 = int_to_ptr.hbm [resolvable:$true] %s82_s24  ;;  %s140_s0 = int_to_ptr.vmem [resolvable:$true] %s139_s0 }
  0x1d   :  { %87 = dma.hbm_to_vmem [thread:$0]  %s83_s24, 16, %s85_s25, [#allocation9]  }
  0x1e   :  { %113 = dma.hbm_to_vmem [thread:$0]  %s109_s27, 16, %s111_s28, [#allocation12]  }
  0x1f   :  { %s161_s5 = sshll.u32 %s2402_s17, 4  ;;  %s1959_s10 = smov 128   ;;  %s162_s5 = int_to_ptr.hbm [resolvable:$true] %s161_s5 }
  0x20   :  { %s1960_s6 = smov 8   ;;  %s2421_s26 = sld [smem:[#allocation31_spill]] }
  0x21   :  { %145 = dma.hbm_to_vmem [thread:$0]  %s138_s21, 2048, %s140_s0, [#allocation15], %s1959_s10, %s1959_s10, %s1960_s6  }
  0x22   :  { %s1961_s2 = smov [#allocation17]   ;;  %s1962_s17 = smov [#allocation2]  }
  0x23   :  { %s163_s27 = sshll.u32 %s1961_s2, 4  ;;  %s42_s3 = sshll.u32 %s1962_s17, 4  ;;  %s164_s27 = int_to_ptr.vmem [resolvable:$true] %s163_s27  ;;  %s43_s3 = int_to_ptr.vmem [resolvable:$true] %s42_s3 }
  0x24   :  { %169 = dma.hbm_to_vmem [thread:$0]  %s162_s5, 2048, %s164_s27, [#allocation18], %s1959_s10, %s1959_s10, %s1960_s6  }
  0x25   :  { %s2422_s4 = sld [smem:[#allocation35_spill]]  ;;  %s95_s23 = sshll.u32 %s2393_s8, 4  ;;  %s96_s23 = int_to_ptr.hbm [resolvable:$true] %s95_s23 }
  0x26   :  { %s40_s15 = sshll.u32 %s2421_s26, 4  ;;  %s1963_s1 = smov [#allocation7]   ;;  %s41_s15 = int_to_ptr.hbm [resolvable:$true] %s40_s15 }
  0x27   :  { %48 = dma.hbm_to_vmem [thread:$0]  %s41_s15, 256, %s43_s3, [#allocation3], %s1959_s10, %s1959_s10, %s1960_s6  }
  0x28   :  { %s71_s24 = sshll.u32 %s1963_s1, 4  ;;  %s1964_s5 = smov [#allocation10]   ;;  %s72_s24 = int_to_ptr.vmem [resolvable:$true] %s71_s24 }
  0x29   :  { %s97_s25 = sshll.u32 %s1964_s5, 4  ;;  %s122_s27 = sshll.u32 %s2398_s13, 4  ;;  %s98_s25 = int_to_ptr.vmem [resolvable:$true] %s97_s25  ;;  %s123_s27 = int_to_ptr.hbm [resolvable:$true] %s122_s27 }
  0x2a   :  { %100 = dma.hbm_to_vmem [thread:$0]  %s96_s23, 16, %s98_s25, [#allocation9]  }
  0x2b   :  { %s69_s30 = sshll.u32 %s2422_s4, 4  ;;  %s151_s3 = sshll.u32 %s2401_s16, 4  ;;  %s70_s30 = int_to_ptr.hbm [resolvable:$true] %s69_s30  ;;  %s152_s3 = int_to_ptr.hbm [resolvable:$true] %s151_s3 }
  0x2c   :  { %74 = dma.hbm_to_vmem [thread:$0]  %s70_s30, 16, %s72_s24, [#allocation6]  }
  0x2d   :  { %s1965_s28 = smov [#allocation13]   ;;  %s1966_s29 = smov [#allocation16]  }
  0x2e   :  { %s124_s8 = sshll.u32 %s1965_s28, 4  ;;  %s153_s4 = sshll.u32 %s1966_s29, 4  ;;  %s125_s8 = int_to_ptr.vmem [resolvable:$true] %s124_s8  ;;  %s154_s4 = int_to_ptr.vmem [resolvable:$true] %s153_s4 }
  0x2f   :  { %130 = dma.hbm_to_vmem [thread:$0]  %s123_s27, 512, %s125_s8, [#allocation12], %s1959_s10, %s1959_s10, %s1960_s6  }
  0x30   :  { %s176_s13 = sshll.u32 %s2404_s19, 4  ;;  %s190_s16 = sshll.u32 %s2405_s20, 4  ;;  %s177_s13 = int_to_ptr.hbm [resolvable:$true] %s176_s13  ;;  %s191_s16 = int_to_ptr.hbm [resolvable:$true] %s190_s16 }
  0x31   :  { %156 = dma.hbm_to_vmem [thread:$0]  %s152_s3, 64, %s154_s4, [#allocation15]  }
  0x32   :  { %s1967_s1 = smov [#allocation19]   ;;  %s1968_s5 = smov [#allocation20]  }
  0x33   :  { %s178_s24 = sshll.u32 %s1967_s1, 4  ;;  %s192_s25 = sshll.u32 %s1968_s5, 4  ;;  %s179_s24 = int_to_ptr.vmem [resolvable:$true] %s178_s24  ;;  %s193_s25 = int_to_ptr.vmem [resolvable:$true] %s192_s25 }
  0x34   :  { %184 = dma.hbm_to_vmem [thread:$0]  %s177_s13, 2048, %s179_s24, [#allocation18], %s1959_s10, %s1959_s10, %s1960_s6  }
  0x35   :  { %195 = dma.hbm_to_vmem [thread:$0]  %s191_s16, 64, %s193_s25, [#allocation21]  }
  0x36   :  { %1939 = dma.done.wait [#allocation3], 256  }
  0x37   :  { %1940 = vsyncadd [#allocation3], 4294967040 }
  0x38   :  { %1941 = dma.done.wait [#allocation6], 32  }
  0x39   :  { %1942 = vsyncadd [#allocation6], 4294967264 }
  0x3a   :  { %1943 = dma.done.wait [#allocation9], 32  }
  0x3b   :  { %1944 = vsyncadd [#allocation9], 4294967264 }
  0x3c   :  { %1945 = dma.done.wait [#allocation12], 528  }
  0x3d   :  { %1946 = vsyncadd [#allocation12], 4294966768 }
  0x3e   :  { %1947 = dma.done.wait [#allocation15], 2112  }
  0x3f   :  { %1948 = vsyncadd [#allocation15], 4294965184 }
  0x40   :  { %1949 = dma.done.wait [#allocation18], 4096  }
  0x41   :  { %1950 = vsyncadd [#allocation18], 4294963200 }
  0x42   :  { %1951 = dma.done.wait [#allocation21], 64  }
  0x43   :  { %1952 = vsyncadd [#allocation21], 4294967232  ;;  %s2423_s26 = sld [smem:[#allocation34_spill]]  ;;  %v2149_v2 = vld [vmem:[#allocation2] sm:$0xff]  ;;  %s1969_s3 = smov 120   ;;  %vm268_vm0 = vcmask 261120  }
  0x44   :  { %801 = vrot.lane.b32.xlu0 %v2149_v2, %s1969_s3  ;;  %v535_v5 = vld [vmem:[#allocation13] sm:$0xff]  ;;  %v2160_v6 = vld [vmem:[#allocation2 + $0x8] sm:$0xff]  ;;  %vm592_vm1 = vcmask 64512   ;;  %s1970_s29 = smov 112   ;;  %s2424_s21 = sld [smem:[#allocation36_spill]]  ;;  %v543_v12 = vld [vmem:[#allocation14 + $0x18] sm:$0xff] }
  0x45   :  { %1011 = vrot.lane.b32.xlu1 %v2149_v2, %s1970_s29  ;;  %v1554_v11 = vld [vmem:[#allocation7] ss:$0 sm:$0xff]  ;;  %v542_v13 = vld [vmem:[#allocation14 + $0x10] sm:$0xff]  ;;  %v541_v16 = vld [vmem:[#allocation14 + $0x8] sm:$0xff]  ;;  %s2425_s2 = sld [smem:[#allocation32_spill]]  ;;  %vm382_vm6 = vcmask 1043456  }
  0x46   :  { %v540_v18 = vld [vmem:[#allocation14] sm:$0xff]  ;;  %v531_v28 = vld [vmem:[%s2396_s11 + $0x8] sm:$0xff]  ;;  %vm375_vm7 = vcmask 31744   ;;  %s2426_s27 = sld [smem:[#allocation38_spill]] }
  0x47   :  { %v2186_v22 = vld [vmem:[%s2399_s14] sm:$0xf] }
  0x48   :  { %v620_v26 = vperm.slane %v2186_v22, 0  ;;  %v536_v36 = vld [vmem:[#allocation13 + $0x8] sm:$0xff] }
  0x49   :  { %v254_v0 = vld [vmem:[%s2423_s26 + $0x18] sm:$0xff]  ;;  %v253_v1 = vld [vmem:[%s2423_s26 + $0x10] sm:$0xff]  ;;  %v252_v3 = vld [vmem:[%s2423_s26 + $0x8] sm:$0xff] }
  0x4a   :  { %313 = vmatpush.msra.mxu1 %v254_v0  ;;  %v251_v4 = vld [vmem:[%s2423_s26] sm:$0xff]  ;;  %v259_v7 = vld [vmem:[%s2424_s21 + $0x18] sm:$0xff]  ;;  %v258_v8 = vld [vmem:[%s2424_s21 + $0x10] sm:$0xff] }
  0x4b   :  { %361 = vmatpush.msra.mxu2 %v259_v7  ;;  %v257_v9 = vld [vmem:[%s2424_s21 + $0x8] sm:$0xff]  ;;  %v256_v10 = vld [vmem:[%s2424_s21] sm:$0xff]  ;;  %v249_v49 = vld [vmem:[%s2425_s2 + $0x18] sm:$0xff] }
  0x4c   :  { %314 = vmatpush.msra.mxu1 %v253_v1  ;;  %803 = vrot.lane.b32.xlu0 %v2160_v6, %s1969_s3  ;;  %v248_v50 = vld [vmem:[%s2425_s2 + $0x10] sm:$0xff]  ;;  %v247_v52 = vld [vmem:[%s2425_s2 + $0x8] sm:$0xff]  ;;  %v246_v54 = vld [vmem:[%s2425_s2] sm:$0xff]  ;;  %s1438_s17 = sshll.u32 %s2426_s27, 4  ;;  %s1439_s17 = int_to_ptr.hbm [resolvable:$true] %s1438_s17 }
  0x4d   :  { %1013 = vrot.lane.b32.xlu1 %v2160_v6, %s1970_s29  ;;  %362 = vmatpush.msra.mxu2 %v258_v8  ;;  %v261_v62 = vld [vmem:[%s2392_s7] sm:$0xf]  ;;  %v1555_v1 = vld [vmem:[#allocation8] ss:$0 sm:$0xff]  ;;  %v575_v8 = vld [vmem:[#allocation19 + $0x8] sm:$0xff]  ;;  %s1971_s7 = smov 104  }
  0x4e   :  { %315 = vmatpush.msra.mxu1 %v252_v3  ;;  %287 = vmatpush.msra.mxu0 %v249_v49  ;;  %v530_v63 = vld [vmem:[%s2396_s11] sm:$0xff]  ;;  %v576_v7 = vld [vmem:[#allocation19 + $0x10] sm:$0xff] }
  0x4f   :  { %363 = vmatpush.msra.mxu2 %v257_v9  ;;  %1523 = vmatpush.msk.msra.mxu3 %vm382_vm6, %v261_v62  ;;  %v263_v0 = vld [vmem:[%s2394_s9] sm:$0xf] }
  0x50   :  { %316 = vmatpush.msra.mxu1 %v251_v4  ;;  %288 = vmatpush.msra.mxu0 %v248_v50  ;;  %v574_v9 = vld [vmem:[#allocation19] sm:$0xff]  ;;  %v1557_v50 = vld [vmem:[#allocation10] ss:$0 sm:$0xff] }
  0x51   :  { %1463 = vmatmul.msk.f32.vlgmr.msra.gmra.mxu1 %vm268_vm0, %v2149_v2  ;;  %364 = vmatpush.msra.mxu2 %v256_v10 }
  0x52   :  { %636 = vmatpush.msrb.mxu1 %v535_v5  ;;  %289 = vmatpush.msra.mxu0 %v247_v52  ;;  %v577_v5 = vld [vmem:[#allocation19 + $0x18] sm:$0xff] }
  0x53   :  { %679 = vmatpush.msrb.mxu2 %v543_v12  ;;  %1472 = vmatpush.msk.msrb.mxu3 %vm382_vm6, %v263_v0  ;;  %v560_v12 = vld [vmem:[#allocation17 + $0x18] sm:$0xff]  ;;  %v580_v0 = vld [vmem:[#allocation19 + $0x30] sm:$0xff] }
  0x54   :  { %824 = vmatpush.msra.mxu1 %v531_v28  ;;  %290 = vmatpush.msra.mxu0 %v246_v54 }
  0x55   :  { %680 = vmatpush.msrb.mxu2 %v542_v13  ;;  %1461 = vmatmul.msk.f32.vlgmr.msra.gmra.mxu0 %vm268_vm0, %v2149_v2  ;;  %v559_v13 = vld [vmem:[#allocation17 + $0x10] sm:$0xff] }
  0x56   :  { %1469 = vmatpush.msk.msrb.mxu0 %vm382_vm6, %v261_v62  ;;  %1221 = vrot.lane.b32.xlu2 %v2149_v2, %s1971_s7  ;;  %v581_v62 = vld [vmem:[#allocation19 + $0x38] sm:$0xff] }
  0x57   :  { %681 = vmatpush.msrb.mxu2 %v541_v16 }
  0x58   :  { %612 = vmatpush.msra.mxu0 %v530_v63  ;;  %v563_v63 = vld [vmem:[#allocation17 + $0x30] sm:$0xff] }
  0x59   :  { %1464 = vmatmul.msk.f32.gmra.mxu1 %vm268_vm0, %v2160_v6  ;;  %682 = vmatpush.msrb.mxu2 %v540_v18  ;;  %v2229_v18 = vld [vmem:[#allocation16] sm:$0xf] }
  0x5d   :  { %1462 = vmatmul.msk.f32.gmra.mxu0 %vm268_vm0, %v2160_v6 }
  0x5e   :  { %1223 = vrot.lane.b32.xlu2 %v2160_v6, %s1971_s7 }
  0x61   :  { %1477 = vmatmul.msk.f32.vlgmr.msrb.gmra.mxu1 %vm592_vm1, %v2149_v2 }
  0x62   :  { %983 = vmatpush.msrb.mxu1 %v581_v62  ;;  %v549_v62 = vld [vmem:[#allocation14 + $0x48] sm:$0xff] }
  0x64   :  { %984 = vmatpush.msrb.mxu1 %v580_v0  ;;  %v548_v0 = vld [vmem:[#allocation14 + $0x40] sm:$0xff] }
  0x69   :  { %1478 = vmatmul.msk.f32.gmra.mxu1 %vm592_vm1, %v2160_v6 }
  0xb6   :  { %v802_v27 = vpop.permute.xlu0 %801 }
  0xb7   :  { %1487 = vmatmul.msk.f32.vlgmr.msra.gmra.mxu1 %vm592_vm1, %v802_v27 }
  0xbe   :  { %v804_v39 = vpop.permute.xlu0 %803 }
  0xbf   :  { %1488 = vmatmul.msk.f32.gmra.mxu1 %vm592_vm1, %v804_v39 }
  0xce   :  { %v318_v14 = vpop.f32.mrf.mxu1 }
  0xcf   :  { %v319_v15 = vadd.f32 %v1554_v11, %v318_v14  ;;  %v558_v14 = vld [vmem:[#allocation17 + $0x8] sm:$0xff] }
  0xd1   :  { %v326_v17 = vmin.f32 %v319_v15, 0.0  ;;  %vm324_vm2 = vcmp.gt.f32.partialorder %v319_v15, 0.0 }
  0xd3   :  { %v328_v19 = vmul.f32 1.442695, %v326_v17  ;;  %v547_v17 = vld [vmem:[#allocation14 + $0x38] sm:$0xff] }
  0xd5   :  { %1559 = vpow2.f32 %v328_v19  ;;  %v546_v19 = vld [vmem:[#allocation14 + $0x30] sm:$0xff] }
  0xd6   :  { %v321_v20 = vpop.f32.mrf.mxu1 }
  0xd7   :  { %v322_v21 = vadd.f32 %v1554_v11, %v321_v20  ;;  %v660_v20 = vperm.slane %v2229_v18, 0 }
  0xd9   :  { %v327_v23 = vmin.f32 %v322_v21, 0.0  ;;  %vm325_vm3 = vcmp.gt.f32.partialorder %v322_v21, 0.0 }
  0xdb   :  { %v1560_v24 = vpop.eup %1559  ;;  %v330_v25 = vmul.f32 1.442695, %v327_v23  ;;  %v544_v23 = vld [vmem:[#allocation14 + $0x20] sm:$0xff] }
  0xdc   :  { %v1465_v29 = vadd.f32 -1.0, %v1560_v24 }
  0xdd   :  { %1561 = vpow2.f32 %v330_v25 }
  0xde   :  { %v334_v30 = vmul.f32 1.6732632, %v1465_v29  ;;  %v638_v31 = vpop.f32.mrf.mxu1 }
  0xdf   :  { %v639_v32 = vadd.f32 %v638_v31, %v620_v26  ;;  %v537_v31 = vld [vmem:[#allocation13 + $0x10] sm:$0xff] }
  0xe0   :  { %v336_v33 = vsel %vm324_vm2, %v319_v15, %v334_v30  ;;  %v557_v15 = vld [vmem:[#allocation17] sm:$0xff] }
  0xe1   :  { %v646_v34 = vmin.f32 %v639_v32, 0.0  ;;  %v338_v35 = vmul.f32 1.050701, %v336_v33  ;;  %vm644_vm4 = vcmp.gt.f32.partialorder %v639_v32, 0.0 }
  0xe3   :  { %v1562_v37 = vpop.eup %1561  ;;  %v648_v38 = vmul.f32 1.442695, %v646_v34  ;;  %1467 = vmatmul.msk.f32.vlgmr.msra.gmra.mxu2 %vm268_vm0, %v338_v35 }
  0xe4   :  { %v1466_v40 = vadd.f32 -1.0, %v1562_v37  ;;  %848 = vmatpush.msra.mxu2 %v536_v36 }
  0xe5   :  { %1563 = vpow2.f32 %v648_v38 }
  0xe6   :  { %v335_v41 = vmul.f32 1.6732632, %v1466_v40  ;;  %v641_v42 = vpop.f32.mrf.mxu1 }
  0xe7   :  { %v642_v43 = vadd.f32 %v641_v42, %v620_v26  ;;  %v1012_v26 = vpop.permute.xlu1 %1011 }
  0xe8   :  { %v337_v44 = vsel %vm325_vm3, %v322_v21, %v335_v41  ;;  %v545_v21 = vld [vmem:[#allocation14 + $0x28] sm:$0xff] }
  0xe9   :  { %v647_v45 = vmin.f32 %v642_v43, 0.0  ;;  %v339_v46 = vmul.f32 1.050701, %v337_v44  ;;  %vm645_vm5 = vcmp.gt.f32.partialorder %v642_v43, 0.0 }
  0xeb   :  { %v1564_v47 = vpop.eup %1563  ;;  %v650_v48 = vmul.f32 1.442695, %v647_v45  ;;  %1468 = vmatmul.msk.f32.gmra.mxu2 %vm268_vm0, %v339_v46 }
  0xec   :  { %v1479_v51 = vadd.f32 -1.0, %v1564_v47 }
  0xed   :  { %1565 = vpow2.f32 %v650_v48  ;;  %v292_v48 = vpop.f32.mrf.mxu0 }
  0xee   :  { %v654_v53 = vmul.f32 1.6732632, %v1479_v51 }
  0xef   :  { %v1014_v33 = vpop.permute.xlu1 %1013 }
  0xf0   :  { %v656_v55 = vsel %vm644_vm4, %v639_v32, %v654_v53 }
  0xf1   :  { %v658_v56 = vmul.f32 1.050701, %v656_v55 }
  0xf3   :  { %v1566_v57 = vpop.eup %1565  ;;  %1481 = vmatmul.msk.f32.vlgmr.msrb.gmra.mxu2 %vm268_vm0, %v658_v56 }
  0xf4   :  { %v1480_v58 = vadd.f32 -1.0, %v1566_v57 }
  0xf5   :  { %v2252_v49 = vpop.f32.mrf.mxu0 }
  0xf6   :  { %v655_v59 = vmul.f32 1.6732632, %v1480_v58 }
  0xf8   :  { %v657_v60 = vsel %vm645_vm5, %v642_v43, %v655_v59 }
  0xf9   :  { %v659_v61 = vmul.f32 1.050701, %v657_v60 }
  0xfb   :  { %1482 = vmatmul.msk.f32.gmra.mxu2 %vm268_vm0, %v659_v61  ;;  %v564_v61 = vld [vmem:[#allocation17 + $0x38] sm:$0xff] }
 0x103   :  { %1489 = vmatmul.msk.f32.vlgmr.msra.gmra.mxu2 %vm592_vm1, %v802_v27  ;;  %v532_v27 = vld [vmem:[%s2396_s11 + $0x10] sm:$0xff] }
 0x104   :  { %1034 = vmatpush.msrb.mxu2 %v532_v27 }
 0x10b   :  { %1490 = vmatmul.msk.f32.gmra.mxu2 %vm592_vm1, %v804_v39 }
 0x113   :  { %1499 = vmatmul.msk.f32.vlgmr.msrb.gmra.mxu2 %vm592_vm1, %v1012_v26 }
 0x11b   :  { %1500 = vmatmul.msk.f32.gmra.mxu2 %vm592_vm1, %v1014_v33 }
 0x166   :  { %v366_v3 = vpop.f32.mrf.mxu2 }
 0x167   :  { %v367_v4 = vadd.f32 %v1555_v1, %v366_v3 }
 0x169   :  { %1470 = vmatmul.msk.f32.vlgmr.msrb.gmra.mxu0 %vm375_vm7, %v367_v4 }
 0x16a   :  { %771 = vmatpush.msrb.mxu0 %v577_v5  ;;  %v562_v5 = vld [vmem:[#allocation17 + $0x28] sm:$0xff] }
 0x16c   :  { %772 = vmatpush.msrb.mxu0 %v576_v7  ;;  %v579_v7 = vld [vmem:[#allocation19 + $0x28] sm:$0xff] }
 0x16d   :  { %985 = vmatpush.msrb.mxu1 %v579_v7  ;;  %v2279_v7 = vld [vmem:[%s2397_s12] sm:$0xf] }
 0x16e   :  { %v369_v10 = vpop.f32.mrf.mxu2  ;;  %773 = vmatpush.msrb.mxu0 %v575_v8 }
 0x16f   :  { %v370_v11 = vadd.f32 %v1555_v1, %v369_v10  ;;  %v578_v10 = vld [vmem:[#allocation19 + $0x20] sm:$0xff] }
 0x170   :  { %774 = vmatpush.msrb.mxu0 %v574_v9  ;;  %v561_v9 = vld [vmem:[#allocation17 + $0x20] sm:$0xff]  ;;  %986 = vmatpush.msrb.mxu1 %v578_v10 }
 0x171   :  { %1471 = vmatmul.msk.f32.vlgmr.msra.gmra.mxu3 %vm375_vm7, %v370_v11  ;;  %1475 = vmatmul.msk.f32.vlgmr.msra.gmra.mxu0 %vm592_vm1, %v2149_v2  ;;  %v832_v2 = vperm.slane %v2186_v22, 1 }
 0x172   :  { %709 = vmatpush.msra.mxu3 %v560_v12  ;;  %921 = vmatpush.msra.mxu0 %v564_v61 }
 0x174   :  { %710 = vmatpush.msra.mxu3 %v559_v13  ;;  %922 = vmatpush.msra.mxu0 %v563_v63  ;;  %v1556_v13 = vld [vmem:[#allocation5] ss:$0 sm:$0xff] }
 0x176   :  { %v684_v16 = vpop.f32.mrf.mxu2  ;;  %711 = vmatpush.msra.mxu3 %v558_v14  ;;  %923 = vmatpush.msra.mxu0 %v562_v5 }
 0x177   :  { %v685_v25 = vadd.f32 %v684_v16, %v660_v20  ;;  %v1558_v16 = vld [vmem:[#allocation11] ss:$0 sm:$0xff] }
 0x178   :  { %712 = vmatpush.msra.mxu3 %v557_v15  ;;  %924 = vmatpush.msra.mxu0 %v561_v9  ;;  %v591_v9 = vperm.slane %v2279_v7, 0 }
 0x179   :  { %1473 = vmatmul.msk.f32.vlgmr.msrb.gmra.mxu3 %vm375_vm7, %v367_v4  ;;  %1476 = vmatmul.msk.f32.gmra.mxu0 %vm592_vm1, %v2160_v6 }
 0x17a   :  { %891 = vmatpush.msrb.mxu3 %v547_v17 }
 0x17c   :  { %892 = vmatpush.msrb.mxu3 %v546_v19 }
 0x17e   :  { %v687_v24 = vpop.f32.mrf.mxu2  ;;  %893 = vmatpush.msrb.mxu3 %v545_v21 }
 0x17f   :  { %v688_v29 = vadd.f32 %v687_v24, %v660_v20 }
 0x180   :  { %894 = vmatpush.msrb.mxu3 %v544_v23  ;;  %v293_v23 = vadd.f32 %v1556_v13, %v292_v48 }
 0x181   :  { %1474 = vmatmul.msk.f32.gmra.mxu3 %vm375_vm7, %v370_v11  ;;  %1485 = vmatmul.msk.f32.vlgmr.msrb.gmra.mxu0 %vm268_vm0, %v685_v25 }
 0x186   :  { %v850_v28 = vpop.f32.mrf.mxu2 }
 0x187   :  { %v851_v30 = vadd.f32 %v850_v28, %v832_v2 }
 0x189   :  { %v858_v32 = vmin.f32 %v851_v30, 0.0  ;;  %1483 = vmatmul.msk.f32.vlgmr.msra.gmra.mxu3 %vm268_vm0, %v685_v25  ;;  %1486 = vmatmul.msk.f32.gmra.mxu0 %vm268_vm0, %v688_v29  ;;  %vm856_vm8 = vcmp.gt.f32.partialorder %v851_v30, 0.0 }
 0x18a   :  { %1058 = vmatpush.msra.mxu3 %v537_v31 }
 0x18b   :  { %v860_v6 = vmul.f32 1.442695, %v858_v32 }
 0x18d   :  { %1567 = vpow2.f32 %v860_v6 }
 0x18e   :  { %v853_v34 = vpop.f32.mrf.mxu2 }
 0x18f   :  { %v854_v35 = vadd.f32 %v853_v34, %v832_v2 }
 0x191   :  { %v859_v36 = vmin.f32 %v854_v35, 0.0  ;;  %1484 = vmatmul.msk.f32.gmra.mxu3 %vm268_vm0, %v688_v29  ;;  %vm857_vm9 = vcmp.gt.f32.partialorder %v854_v35, 0.0 }
 0x193   :  { %v1568_v37 = vpop.eup %1567  ;;  %v862_v38 = vmul.f32 1.442695, %v859_v36 }
 0x194   :  { %v1491_v39 = vadd.f32 -1.0, %v1568_v37 }
 0x195   :  { %1569 = vpow2.f32 %v862_v38 }
 0x196   :  { %v866_v40 = vmul.f32 1.6732632, %v1491_v39 }
 0x198   :  { %v868_v41 = vsel %vm856_vm8, %v851_v30, %v866_v40 }
 0x199   :  { %v870_v42 = vmul.f32 1.050701, %v868_v41  ;;  %v296_v41 = vadd.f32 %v1556_v13, %v2252_v49  ;;  %v538_v13 = vld [vmem:[#allocation13 + $0x18] sm:$0xff] }
 0x19b   :  { %v1570_v43 = vpop.eup %1569  ;;  %1493 = vmatmul.msk.f32.vlgmr.msrb.gmra.mxu3 %vm268_vm0, %v870_v42 }
 0x19c   :  { %v1492_v44 = vadd.f32 -1.0, %v1570_v43 }
 0x19e   :  { %v867_v45 = vmul.f32 1.6732632, %v1492_v44 }
 0x1a0   :  { %v869_v46 = vsel %vm857_vm9, %v854_v35, %v867_v45 }
 0x1a1   :  { %v871_v47 = vmul.f32 1.050701, %v869_v46 }
 0x1a3   :  { %1494 = vmatmul.msk.f32.gmra.mxu3 %vm268_vm0, %v871_v47 }
 0x1ab   :  { %1501 = vmatmul.msk.f32.vlgmr.msra.gmra.mxu3 %vm592_vm1, %v1012_v26  ;;  %v2257_v26 = vld [vmem:[%s2403_s18] sm:$0xf] }
 0x1ac   :  { %v690_v28 = vperm.slane %v2257_v26, 0 }
 0x1b3   :  { %1502 = vmatmul.msk.f32.gmra.mxu3 %vm592_vm1, %v1014_v33 }
 0x1e6   :  { %v403_v51 = vpop.f32.mrf.mxu0 }
 0x1e7   :  { %v404_v52 = vadd.f32 %v1557_v50, %v403_v51 }
 0x1e9   :  { %v409_v53 = vsub.f32 0.0, %v404_v52 }
 0x1eb   :  { %v411_v54 = vmul.f32 1.442695, %v409_v53 }
 0x1ed   :  { %1571 = vpow2.f32 %v411_v54 }
 0x1ee   :  { %v614_v42 = vpop.f32.mrf.mxu0 }
 0x1f3   :  { %v1572_v55 = vpop.eup %1571 }
 0x1f4   :  { %v415_v56 = vadd.f32 1.0, %v1572_v55  ;;  %v406_v57 = vpop.f32.mrf.mxu3 }
 0x1f5   :  { %v407_v58 = vadd.f32 %v1557_v50, %v406_v57  ;;  %v551_v57 = vld [vmem:[#allocation14 + $0x58] sm:$0xff] }
 0x1f6   :  { %1573 = vrcp.f32 %v415_v56  ;;  %v428_v11 = vand.u32 2147483648, %v415_v56  ;;  %v426_v15 = vand.u32 2147483647, %v415_v56  ;;  %vm422_vm11 = vweird.f32 %v415_v56  ;;  %1101 = vmatpush.msrb.mxu0 %v551_v57 }
 0x1f7   :  { %v410_v59 = vsub.f32 0.0, %v407_v58  ;;  %v2270_v58 = vpop.f32.mrf.mxu0 }
 0x1f8   :  { %v429_v20 = vor.u32 1.1754944e-38, %v428_v11  ;;  %vm427_vm13 = vcmp.eq.f32.partialorder %v426_v15, 8.507059e+37 }
 0x1f9   :  { %v413_v60 = vmul.f32 1.442695, %v410_v59  ;;  %v550_v59 = vld [vmem:[#allocation14 + $0x50] sm:$0xff] }
 0x1fa   :  { %1102 = vmatpush.msrb.mxu0 %v550_v59 }
 0x1fb   :  { %1575 = vpow2.f32 %v413_v60 }
 0x1fc   :  { %v1574_v1 = vpop.eup %1573  ;;  %v470_v3 = vpop.f32.mrf.mxu3  ;;  %1103 = vmatpush.msrb.mxu0 %v549_v62 }
 0x1fd   :  { %v418_v4 = vmul.f32 %v1574_v1, %v415_v56  ;;  %vm423_vm10 = vweird.f32 %v1574_v1  ;;  %v471_v25 = vadd.f32 %v1558_v16, %v470_v3  ;;  %v872_v56 = vperm.slane %v2229_v18, 1 }
 0x1fe   :  { %vm424_vm12 = vmor %vm422_vm11, %vm423_vm10  ;;  %1104 = vmatpush.msrb.mxu0 %v548_v0 }
 0x1ff   :  { %v419_v8 = vsub.f32 1.0, %v418_v4  ;;  %v2274_v4 = vld [vmem:[#allocation20] sm:$0xf]  ;;  %v776_v11 = vpop.f32.mrf.mxu0 }
 0x200   :  { %v758_v10 = vperm.slane %v2274_v4, 0 }
 0x201   :  { %v1576_v12 = vpop.eup %1575  ;;  %v420_v14 = vmul.f32 %v1574_v1, %v419_v8 }
 0x202   :  { %v416_v17 = vadd.f32 1.0, %v1576_v12 }
 0x203   :  { %v421_v19 = vadd.f32 %v1574_v1, %v420_v14 }
 0x204   :  { %1577 = vrcp.f32 %v416_v17  ;;  %v473_v21 = vpop.f32.mrf.mxu3  ;;  %v443_v35 = vand.u32 2147483648, %v416_v17  ;;  %v441_v37 = vand.u32 2147483647, %v416_v17  ;;  %vm437_vm15 = vweird.f32 %v416_v17 }
 0x205   :  { %v425_v24 = vsel %vm424_vm12, %v1574_v1, %v421_v19  ;;  %v474_v45 = vadd.f32 %v1558_v16, %v473_v21  ;;  %v615_v21 = vadd.f32 %v614_v42, %v591_v9  ;;  %v618_v42 = vadd.f32 %v2270_v58, %v591_v9 }
 0x206   :  { %v430_v2 = vsel %vm427_vm13, %v429_v20, %v425_v24  ;;  %v444_v43 = vor.u32 1.1754944e-38, %v443_v35  ;;  %vm442_vm3 = vcmp.eq.f32.partialorder %v441_v37, 8.507059e+37 }
 0x207   :  { %v476_v27 = vmul.f32 %v471_v25, %v430_v2  ;;  %v1042_v2 = vperm.slane %v2186_v22, 2 }
 0x209   :  { %v2260_v29 = vadd.f32 %v476_v27, %v293_v23  ;;  %v777_v23 = vadd.f32 %v776_v11, %v758_v10  ;;  %v1222_v27 = vpop.permute.xlu2 %1221 }
 0x20a   :  { %v1578_v30 = vpop.eup %1577 }
 0x20b   :  { %v433_v31 = vmul.f32 %v1578_v30, %v416_v17  ;;  %v480_v32 = vsel %vm375_vm7, %v2260_v29, -inf  ;;  %vm438_vm14 = vweird.f32 %v1578_v30 }
 0x20c   :  { %v714_v6 = vpop.f32.mrf.mxu3  ;;  %481 = vmax.xlane.f32.xlu0 %v480_v32  ;;  %vm439_vm2 = vmor %vm437_vm15, %vm438_vm14 }
 0x20d   :  { %v434_v33 = vsub.f32 1.0, %v433_v31  ;;  %v715_v34 = vadd.f32 %v714_v6, %v690_v28 }
 0x20f   :  { %v435_v36 = vmul.f32 %v1578_v30, %v434_v33  ;;  %v720_v38 = vsub.f32 0.0, %v715_v34 }
 0x211   :  { %v436_v39 = vadd.f32 %v1578_v30, %v435_v36  ;;  %v722_v40 = vmul.f32 1.442695, %v720_v38 }
 0x213   :  { %v440_v44 = vsel %vm439_vm2, %v1578_v30, %v436_v39  ;;  %1579 = vpow2.f32 %v722_v40  ;;  %v779_v39 = vpop.f32.mrf.mxu0 }
 0x214   :  { %v445_v46 = vsel %vm442_vm3, %v444_v43, %v440_v44  ;;  %v717_v47 = vpop.f32.mrf.mxu3  ;;  %v780_v44 = vadd.f32 %v779_v39, %v758_v10 }
 0x215   :  { %v477_v48 = vmul.f32 %v474_v45, %v445_v46  ;;  %v718_v50 = vadd.f32 %v717_v47, %v690_v28  ;;  %v533_v28 = vld [vmem:[%s2396_s11 + $0x18] sm:$0xff]  ;;  %v1224_v46 = vpop.permute.xlu2 %1223 }
 0x216   :  { %1244 = vmatpush.msrb.mxu3 %v533_v28 }
 0x217   :  { %v721_v51 = vsub.f32 0.0, %v718_v50  ;;  %v2265_v52 = vadd.f32 %v477_v48, %v296_v41  ;;  %1511 = vmatmul.msk.f32.vlgmr.msrb.gmra.mxu3 %vm592_vm1, %v1222_v27 }
 0x219   :  { %v1580_v53 = vpop.eup %1579  ;;  %v724_v54 = vmul.f32 1.442695, %v721_v51  ;;  %v483_v55 = vsel %vm375_vm7, %v2265_v52, -inf }
 0x21a   :  { %v726_v49 = vadd.f32 1.0, %v1580_v53  ;;  %484 = vmax.xlane.f32.xlu1 %v483_v55 }
 0x21b   :  { %1581 = vpow2.f32 %v724_v54 }
 0x21c   :  { %1583 = vrcp.f32 %v726_v49  ;;  %v739_v14 = vand.u32 2147483648, %v726_v49  ;;  %v737_v17 = vand.u32 2147483647, %v726_v49  ;;  %vm733_vm5 = vweird.f32 %v726_v49 }
 0x21e   :  { %v896_v60 = vpop.f32.mrf.mxu3  ;;  %v740_v24 = vor.u32 1.1754944e-38, %v739_v14  ;;  %vm738_vm8 = vcmp.eq.f32.partialorder %v737_v17, 8.507059e+37  ;;  %v585_v17 = vld [vmem:[#allocation19 + $0x58] sm:$0xff] }
 0x21f   :  { %v897_v61 = vadd.f32 %v896_v60, %v872_v56  ;;  %1512 = vmatmul.msk.f32.gmra.mxu3 %vm592_vm1, %v1224_v46  ;;  %1193 = vmatpush.msra.mxu2 %v585_v17 }
 0x221   :  { %v1582_v63 = vpop.eup %1581  ;;  %1495 = vmatmul.msk.f32.vlgmr.msra.gmra.mxu0 %vm268_vm0, %v897_v61  ;;  %1497 = vmatmul.msk.f32.vlgmr.msrb.gmra.mxu1 %vm268_vm0, %v897_v61 }
 0x222   :  { %v1584_v1 = vpop.eup %1583  ;;  %v727_v3 = vadd.f32 1.0, %v1582_v63  ;;  %1268 = vmatpush.msra.mxu0 %v538_v13 }
 0x223   :  { %v729_v5 = vmul.f32 %v1584_v1, %v726_v49  ;;  %vm734_vm4 = vweird.f32 %v1584_v1 }
 0x224   :  { %1585 = vrcp.f32 %v727_v3  ;;  %vm735_vm6 = vmor %vm733_vm5, %vm734_vm4  ;;  %v752_v34 = vand.u32 2147483647, %v727_v3  ;;  %v754_v35 = vand.u32 2147483648, %v727_v3  ;;  %vm748_vm10 = vweird.f32 %v727_v3 }
 0x225   :  { %v730_v8 = vsub.f32 1.0, %v729_v5 }
 0x226   :  { %v899_v12 = vpop.f32.mrf.mxu3  ;;  %v755_v43 = vor.u32 1.1754944e-38, %v754_v35  ;;  %vm753_vm12 = vcmp.eq.f32.partialorder %v752_v34, 8.507059e+37 }
 0x227   :  { %v900_v15 = vadd.f32 %v899_v12, %v872_v56  ;;  %v731_v16 = vmul.f32 %v1584_v1, %v730_v8 }
 0x229   :  { %1496 = vmatmul.msk.f32.gmra.mxu0 %vm268_vm0, %v900_v15  ;;  %1498 = vmatmul.msk.f32.gmra.mxu1 %vm268_vm0, %v900_v15  ;;  %v732_v19 = vadd.f32 %v1584_v1, %v731_v16  ;;  %v568_v16 = vld [vmem:[#allocation17 + $0x58] sm:$0xff] }
 0x22a   :  { %v1586_v20 = vpop.eup %1585  ;;  %1131 = vmatpush.msra.mxu1 %v568_v16 }
 0x22b   :  { %v744_v25 = vmul.f32 %v1586_v20, %v727_v3  ;;  %v736_v30 = vsel %vm735_vm6, %v1584_v1, %v732_v19  ;;  %vm749_vm9 = vweird.f32 %v1586_v20  ;;  %v567_v19 = vld [vmem:[#allocation17 + $0x50] sm:$0xff] }
 0x22c   :  { %v741_v31 = vsel %vm738_vm8, %v740_v24, %v736_v30  ;;  %vm750_vm11 = vmor %vm748_vm10, %vm749_vm9  ;;  %1132 = vmatpush.msra.mxu1 %v567_v19  ;;  %v583_v24 = vld [vmem:[#allocation19 + $0x48] sm:$0xff]  ;;  %v826_v30 = vpop.f32.mrf.mxu1 }
 0x22d   :  { %v782_v32 = vmul.f32 %v777_v23, %v741_v31  ;;  %v745_v6 = vsub.f32 1.0, %v744_v25  ;;  %v566_v23 = vld [vmem:[#allocation17 + $0x48] sm:$0xff] }
 0x22e   :  { %v1060_v33 = vpop.f32.mrf.mxu3  ;;  %1133 = vmatpush.msra.mxu1 %v566_v23 }
 0x22f   :  { %v1061_v36 = vadd.f32 %v1060_v33, %v1042_v2  ;;  %v2290_v37 = vadd.f32 %v782_v32, %v615_v21  ;;  %v746_v38 = vmul.f32 %v1586_v20, %v745_v6 }
 0x231   :  { %v1068_v40 = vmin.f32 %v1061_v36, 0.0  ;;  %v747_v41 = vadd.f32 %v1586_v20, %v746_v38  ;;  %vm1066_vm13 = vcmp.gt.f32.partialorder %v1061_v36, 0.0 }
 0x233   :  { %v1070_v45 = vmul.f32 1.442695, %v1068_v40  ;;  %v751_v47 = vsel %vm750_vm11, %v1586_v20, %v747_v41  ;;  %v584_v20 = vld [vmem:[#allocation19 + $0x50] sm:$0xff]  ;;  %v970_v41 = vperm.slane %v2274_v4, 1 }
 0x234   :  { %v756_v48 = vsel %vm753_vm12, %v755_v43, %v751_v47  ;;  %1194 = vmatpush.msra.mxu2 %v584_v20  ;;  %v2313_v6 = vpop.f32.mrf.mxu1  ;;  %v800_v43 = vperm.slane %v2279_v7, 1 }
 0x235   :  { %1587 = vpow2.f32 %v1070_v45  ;;  %v783_v50 = vmul.f32 %v780_v44, %v756_v48  ;;  %v1082_v48 = vperm.slane %v2229_v18, 2 }
 0x236   :  { %v1063_v51 = vpop.f32.mrf.mxu3  ;;  %1195 = vmatpush.msra.mxu2 %v583_v24  ;;  %v1972_v24 = vmov 1  }
 0x237   :  { %v1064_v53 = vadd.f32 %v1063_v51, %v1042_v2  ;;  %v2294_v54 = vadd.f32 %v783_v50, %v618_v42  ;;  %v565_v2 = vld [vmem:[#allocation17 + $0x40] sm:$0xff]  ;;  %v555_v50 = vld [vmem:[#allocation14 + $0x78] sm:$0xff]  ;;  %1547 = vset.pattern.permute.xlu2 %v1972_v24 }
 0x238   :  { %1134 = vmatpush.msra.mxu1 %v565_v2 }
 0x239   :  { %v1069_v55 = vmin.f32 %v1064_v53, 0.0  ;;  %vm1067_vm14 = vcmp.gt.f32.partialorder %v1064_v53, 0.0 }
 0x23a   :  { %1311 = vmatpush.msrb.mxu1 %v555_v50 }
 0x23b   :  { %v1588_v49 = vpop.eup %1587  ;;  %v1072_v56 = vmul.f32 1.442695, %v1069_v55 }
 0x23c   :  { %v1503_v57 = vadd.f32 -1.0, %v1588_v49  ;;  %v554_v49 = vld [vmem:[#allocation14 + $0x70] sm:$0xff] }
 0x23d   :  { %1589 = vpow2.f32 %v1072_v56  ;;  %1312 = vmatpush.msrb.mxu1 %v554_v49 }
 0x23e   :  { %v1076_v58 = vmul.f32 1.6732632, %v1503_v57 }
 0x240   :  { %v1078_v59 = vsel %vm1066_vm13, %v1061_v36, %v1076_v58  ;;  %v553_v58 = vld [vmem:[#allocation14 + $0x68] sm:$0xff] }
 0x241   :  { %v1080_v60 = vmul.f32 1.050701, %v1078_v59  ;;  %1313 = vmatpush.msrb.mxu1 %v553_v58  ;;  %v572_v58 = vld [vmem:[#allocation17 + $0x78] sm:$0xff] }
 0x243   :  { %v1590_v61 = vpop.eup %1589  ;;  %1505 = vmatmul.msk.f32.vlgmr.msrb.gmra.mxu0 %vm268_vm0, %v1080_v60  ;;  %v552_v60 = vld [vmem:[#allocation14 + $0x60] sm:$0xff] }
 0x244   :  { %v1504_v62 = vadd.f32 -1.0, %v1590_v61  ;;  %1314 = vmatpush.msrb.mxu1 %v552_v60  ;;  %v589_v60 = vld [vmem:[#allocation19 + $0x78] sm:$0xff] }
 0x245   :  { %1403 = vmatpush.msra.mxu3 %v589_v60 }
 0x246   :  { %v1077_v63 = vmul.f32 1.6732632, %v1504_v62 }
 0x248   :  { %v1079_v0 = vsel %vm1067_vm14, %v1064_v53, %v1077_v63  ;;  %v827_v53 = vadd.f32 %v826_v30, %v800_v43  ;;  %v1252_v63 = vperm.slane %v2186_v22, 3 }
 0x249   :  { %v1081_v1 = vmul.f32 1.050701, %v1079_v0 }
 0x24b   :  { %1506 = vmatmul.msk.f32.gmra.mxu0 %vm268_vm0, %v1081_v1 }
 0x253   :  { %1513 = vmatmul.msk.f32.vlgmr.msra.gmra.mxu0 %vm592_vm1, %v1222_v27  ;;  %v582_v27 = vld [vmem:[#allocation19 + $0x40] sm:$0xff] }
 0x254   :  { %1196 = vmatpush.msra.mxu2 %v582_v27 }
 0x256   :  { %1341 = vmatpush.msrb.mxu2 %v572_v58 }
 0x25b   :  { %1514 = vmatmul.msk.f32.gmra.mxu0 %vm592_vm1, %v1224_v46 }
 0x27f   :  { %v482_v3 = vpop.xlane.xlu0 %481 }
 0x280   :  { %v486_v5 = vsub.f32 %v2260_v29, %v482_v3  ;;  %v902_v29 = vperm.slane %v2257_v26, 1 }
 0x282   :  { %v488_v8 = vmul.f32 1.442695, %v486_v5 }
 0x284   :  { %1591 = vpow2.f32 %v488_v8 }
 0x28a   :  { %v2301_v9 = vpop.eup %1591 }
 0x28b   :  { %v492_v10 = vsel %vm375_vm7, %v2301_v9, 0.0 }
 0x28c   :  { %493 = vadd.xlane.f32.xlu2 %v492_v10 }
 0x28d   :  { %v485_v11 = vpop.xlane.xlu1 %484 }
 0x28e   :  { %v487_v12 = vsub.f32 %v2265_v52, %v485_v11 }
 0x290   :  { %v490_v13 = vmul.f32 1.442695, %v487_v12 }
 0x292   :  { %1593 = vpow2.f32 %v490_v13 }
 0x298   :  { %v2306_v14 = vpop.eup %1593 }
 0x299   :  { %v495_v15 = vsel %vm375_vm7, %v2306_v14, 0.0 }
 0x29a   :  { %496 = vadd.xlane.f32.xlu2 %v495_v15 }
 0x29e   :  { %v926_v21 = vpop.f32.mrf.mxu0  ;;  %v988_v42 = vpop.f32.mrf.mxu1 }
 0x29f   :  { %v927_v52 = vadd.f32 %v926_v21, %v902_v29  ;;  %v989_v47 = vadd.f32 %v988_v42, %v970_v41 }
 0x2a1   :  { %v932_v25 = vsub.f32 0.0, %v927_v52 }
 0x2a3   :  { %v934_v28 = vmul.f32 1.442695, %v932_v25  ;;  %v1973_v25 = vmov 0  }
 0x2a4   :  { %1546 = vset.pattern.permute.xlu0 %v1973_v25  ;;  %1549 = vset.pattern.permute.xlu1 %v1973_v25 }
 0x2a5   :  { %1595 = vpow2.f32 %v934_v28 }
 0x2a6   :  { %v2315_v38 = vpop.f32.mrf.mxu0 }
 0x2ab   :  { %v1596_v31 = vpop.eup %1595 }
 0x2ac   :  { %v938_v32 = vadd.f32 1.0, %v1596_v31 }
 0x2ae   :  { %1597 = vrcp.f32 %v938_v32  ;;  %v951_v36 = vand.u32 2147483648, %v938_v32  ;;  %v949_v40 = vand.u32 2147483647, %v938_v32  ;;  %vm945_vm15 = vweird.f32 %v938_v32 }
 0x2b0   :  { %v952_v45 = vor.u32 1.1754944e-38, %v951_v36  ;;  %vm950_vm3 = vcmp.eq.f32.partialorder %v949_v40, 8.507059e+37 }
 0x2b4   :  { %v1598_v33 = vpop.eup %1597 }
 0x2b5   :  { %v941_v34 = vmul.f32 %v1598_v33, %v938_v32  ;;  %vm946_vm1 = vweird.f32 %v1598_v33 }
 0x2b6   :  { %vm947_vm2 = vmor %vm945_vm15, %vm946_vm1 }
 0x2b7   :  { %v942_v35 = vsub.f32 1.0, %v941_v34 }
 0x2b9   :  { %v943_v39 = vmul.f32 %v1598_v33, %v942_v35 }
 0x2bb   :  { %v944_v44 = vadd.f32 %v1598_v33, %v943_v39 }
 0x2bd   :  { %v948_v46 = vsel %vm947_vm2, %v1598_v33, %v944_v44 }
 0x2be   :  { %v953_v51 = vsel %vm950_vm3, %v952_v45, %v948_v46 }
 0x2bf   :  { %v994_v55 = vmul.f32 %v989_v47, %v953_v51 }
 0x2c0   :  { %v1106_v56 = vpop.f32.mrf.mxu0 }
 0x2c1   :  { %v1107_v57 = vadd.f32 %v1106_v56, %v1082_v48  ;;  %v2324_v59 = vadd.f32 %v994_v55, %v827_v53  ;;  %v1974_v53 = vmov 2   ;;  %v1975_v55 = vmov 3  }
 0x2c3   :  { %1507 = vmatmul.msk.f32.vlgmr.msra.gmra.mxu1 %vm268_vm0, %v1107_v57  ;;  %1509 = vmatmul.msk.f32.vlgmr.msra.gmra.mxu2 %vm268_vm0, %v1107_v57 }
 0x2c8   :  { %v1109_v61 = vpop.f32.mrf.mxu0 }
 0x2c9   :  { %v1110_v62 = vadd.f32 %v1109_v61, %v1082_v48  ;;  %v2343_v61 = vpop.f32.mrf.mxu1 }
 0x2cb   :  { %1508 = vmatmul.msk.f32.gmra.mxu1 %vm268_vm0, %v1110_v62  ;;  %1510 = vmatmul.msk.f32.gmra.mxu2 %vm268_vm0, %v1110_v62  ;;  %v588_v62 = vld [vmem:[#allocation19 + $0x70] sm:$0xff] }
 0x2cc   :  { %1404 = vmatpush.msra.mxu3 %v588_v62 }
 0x2d0   :  { %v1270_v0 = vpop.f32.mrf.mxu0 }
 0x2d1   :  { %v1271_v1 = vadd.f32 %v1270_v0, %v1252_v63  ;;  %v587_v0 = vld [vmem:[#allocation19 + $0x68] sm:$0xff] }
 0x2d2   :  { %1405 = vmatpush.msra.mxu3 %v587_v0 }
 0x2d3   :  { %v1278_v3 = vmin.f32 %v1271_v1, 0.0  ;;  %vm1276_vm4 = vcmp.gt.f32.partialorder %v1271_v1, 0.0 }
 0x2d5   :  { %v1280_v5 = vmul.f32 1.442695, %v1278_v3  ;;  %v586_v3 = vld [vmem:[#allocation19 + $0x60] sm:$0xff] }
 0x2d6   :  { %1406 = vmatpush.msra.mxu3 %v586_v3 }
 0x2d7   :  { %1599 = vpow2.f32 %v1280_v5  ;;  %v1112_v5 = vperm.slane %v2257_v26, 2 }
 0x2d8   :  { %v1273_v8 = vpop.f32.mrf.mxu0 }
 0x2d9   :  { %v1274_v10 = vadd.f32 %v1273_v8, %v1252_v63  ;;  %v570_v63 = vld [vmem:[#allocation17 + $0x68] sm:$0xff] }
 0x2db   :  { %v1279_v11 = vmin.f32 %v1274_v10, 0.0  ;;  %vm1277_vm5 = vcmp.gt.f32.partialorder %v1274_v10, 0.0 }
 0x2dd   :  { %v1600_v12 = vpop.eup %1599  ;;  %v1282_v13 = vmul.f32 1.442695, %v1279_v11 }
 0x2de   :  { %v1515_v15 = vadd.f32 -1.0, %v1600_v12 }
 0x2df   :  { %1601 = vpow2.f32 %v1282_v13 }
 0x2e0   :  { %v1286_v16 = vmul.f32 1.6732632, %v1515_v15 }
 0x2e2   :  { %v1288_v17 = vsel %vm1276_vm4, %v1271_v1, %v1286_v16  ;;  %v569_v1 = vld [vmem:[#allocation17 + $0x60] sm:$0xff]  ;;  %v930_v16 = vadd.f32 %v2315_v38, %v902_v29 }
 0x2e3   :  { %v1290_v19 = vmul.f32 1.050701, %v1288_v17 }
 0x2e5   :  { %v1602_v20 = vpop.eup %1601  ;;  %1517 = vmatmul.msk.f32.vlgmr.msrb.gmra.mxu1 %vm268_vm0, %v1290_v19  ;;  %v1292_v19 = vperm.slane %v2229_v18, 3 }
 0x2e6   :  { %v1516_v22 = vadd.f32 -1.0, %v1602_v20 }
 0x2e8   :  { %v1287_v21 = vmul.f32 1.6732632, %v1516_v22  ;;  %v933_v22 = vsub.f32 0.0, %v930_v16 }
 0x2ea   :  { %v1289_v52 = vsel %vm1277_vm5, %v1274_v10, %v1287_v21 }
 0x2eb   :  { %v1291_v23 = vmul.f32 1.050701, %v1289_v52  ;;  %v936_v52 = vmul.f32 1.442695, %v933_v22 }
 0x2ed   :  { %1518 = vmatmul.msk.f32.gmra.mxu1 %vm268_vm0, %v1291_v23 }
 0x2ff   :  { %v494_v2 = vpop.xlane.xlu2 %493 }
 0x300   :  { %1603 = vrcp.f32 %v494_v2  ;;  %v509_v31 = vand.u32 2147483648, %v494_v2  ;;  %v507_v33 = vand.u32 2147483647, %v494_v2  ;;  %vm503_vm8 = vweird.f32 %v494_v2 }
 0x302   :  { %v510_v36 = vor.u32 1.1754944e-38, %v509_v31  ;;  %vm508_vm10 = vcmp.eq.f32.partialorder %v507_v33, 8.507059e+37 }
 0x306   :  { %v1604_v27 = vpop.eup %1603 }
 0x307   :  { %v499_v28 = vmul.f32 %v1604_v27, %v494_v2  ;;  %vm504_vm6 = vweird.f32 %v1604_v27  ;;  %v1036_v2 = vpop.f32.mrf.mxu2 }
 0x308   :  { %vm505_vm9 = vmor %vm503_vm8, %vm504_vm6 }
 0x309   :  { %v500_v30 = vsub.f32 1.0, %v499_v28 }
 0x30b   :  { %v501_v32 = vmul.f32 %v1604_v27, %v500_v30 }
 0x30d   :  { %v502_v34 = vadd.f32 %v1604_v27, %v501_v32  ;;  %v497_v35 = vpop.xlane.xlu2 %496 }
 0x30e   :  { %1605 = vrcp.f32 %v497_v35  ;;  %v524_v47 = vand.u32 2147483648, %v497_v35  ;;  %v522_v50 = vand.u32 2147483647, %v497_v35  ;;  %vm518_vm12 = vweird.f32 %v497_v35 }
 0x30f   :  { %v506_v39 = vsel %vm505_vm9, %v1604_v27, %v502_v34  ;;  %v2354_v33 = vpop.f32.mrf.mxu2 }
 0x310   :  { %v511_v40 = vsel %vm508_vm10, %v510_v36, %v506_v39  ;;  %vm523_vm14 = vcmp.eq.f32.partialorder %v522_v50, 8.507059e+37 }
 0x311   :  { %v512_v42 = vmul.f32 %v2301_v9, %v511_v40  ;;  %v525_v9 = vor.u32 1.1754944e-38, %v524_v47 }
 0x313   :  { %999 = vperm.xlu2 %1547, %v512_v42   ;;  %528 = vst.msk [vmem:[%s2407_s22] sm:$0xff] %vm375_vm7, %v512_v42  ;;  %788 = vperm.xlu0 %1546, %v512_v42  }
 0x314   :  { %v1606_v44 = vpop.eup %1605 }
 0x315   :  { %v514_v45 = vmul.f32 %v1606_v44, %v497_v35  ;;  %vm519_vm11 = vweird.f32 %v1606_v44 }
 0x316   :  { %vm520_vm13 = vmor %vm518_vm12, %vm519_vm11 }
 0x317   :  { %v515_v46 = vsub.f32 1.0, %v514_v45 }
 0x319   :  { %v516_v48 = vmul.f32 %v1606_v44, %v515_v46 }
 0x31b   :  { %v517_v51 = vadd.f32 %v1606_v44, %v516_v48  ;;  %1548 = vset.pattern.permute.xlu2 %v1974_v53  ;;  %1553 = vset.pattern.permute.xlu0 %v1975_v55 }
 0x31c   :  { %1209 = vperm.xlu2 %1548, %v512_v42  }
 0x31d   :  { %v521_v49 = vsel %vm520_vm13, %v1606_v44, %v517_v51  ;;  %v1180_v44 = vperm.slane %v2274_v4, 2  ;;  %v1010_v51 = vperm.slane %v2279_v7, 2 }
 0x31e   :  { %v526_v56 = vsel %vm523_vm14, %v525_v9, %v521_v49 }
 0x31f   :  { %v527_v57 = vmul.f32 %v2306_v14, %v526_v56  ;;  %v571_v14 = vld [vmem:[#allocation17 + $0x70] sm:$0xff]  ;;  %v1037_v49 = vadd.f32 %v1036_v2, %v1010_v51 }
 0x320   :  { %1342 = vmatpush.msrb.mxu2 %v571_v14 }
 0x321   :  { %1423 = vperm.xlu0 %1553, %v527_v57   ;;  %529 = vst.msk [vmem:[%s2407_s22 + $0x8] sm:$0xff] %vm375_vm7, %v527_v57  ;;  %793 = vperm.xlu1 %1549, %v527_v57   ;;  %s1976_s22 = smov [#allocation22]  }
 0x322   :  { %1343 = vmatpush.msrb.mxu2 %v570_v63  ;;  %s1436_s14 = sshll.u32 %s1976_s22, 4  ;;  %s1437_s14 = int_to_ptr.vmem [resolvable:$true] %s1436_s14 }
 0x324   :  { %1552 = vset.pattern.permute.xlu2 %v1975_v55  ;;  %1344 = vmatpush.msrb.mxu2 %v569_v1 }
 0x325   :  { %1419 = vperm.xlu2 %1552, %v512_v42  }
 0x329   :  { %1550 = vset.pattern.permute.xlu1 %v1972_v24 }
 0x32a   :  { %1003 = vperm.xlu1 %1550, %v527_v57  }
 0x332   :  { %1551 = vset.pattern.permute.xlu1 %v1974_v53 }
 0x333   :  { %1213 = vperm.xlu1 %1551, %v527_v57  }
 0x340   :  { %v1136_v8 = vpop.f32.mrf.mxu1 }
 0x341   :  { %v1137_v10 = vadd.f32 %v1136_v8, %v1112_v5 }
 0x343   :  { %v1142_v11 = vsub.f32 0.0, %v1137_v10 }
 0x345   :  { %v1144_v12 = vmul.f32 1.442695, %v1142_v11 }
 0x346   :  { %v1198_v46 = vpop.f32.mrf.mxu2 }
 0x347   :  { %1607 = vpow2.f32 %v1144_v12  ;;  %v1199_v53 = vadd.f32 %v1198_v46, %v1180_v44 }
 0x348   :  { %v1139_v13 = vpop.f32.mrf.mxu1 }
 0x349   :  { %v1140_v23 = vadd.f32 %v1139_v13, %v1112_v5 }
 0x34b   :  { %v1143_v29 = vsub.f32 0.0, %v1140_v23  ;;  %v830_v23 = vadd.f32 %v2313_v6, %v800_v43  ;;  %v1322_v43 = vperm.slane %v2257_v26, 3 }
 0x34d   :  { %v1608_v15 = vpop.eup %1607  ;;  %v1146_v38 = vmul.f32 1.442695, %v1143_v29 }
 0x34e   :  { %v1148_v17 = vadd.f32 1.0, %v1608_v15  ;;  %v1201_v2 = vpop.f32.mrf.mxu2 }
 0x350   :  { %1609 = vrcp.f32 %v1148_v17  ;;  %v1161_v35 = vand.u32 2147483648, %v1148_v17  ;;  %vm1155_vm1 = vweird.f32 %v1148_v17  ;;  %v1159_v39 = vand.u32 2147483647, %v1148_v17 }
 0x351   :  { %1611 = vpow2.f32 %v936_v52 }
 0x352   :  { %1613 = vpow2.f32 %v1146_v38  ;;  %v1162_v45 = vor.u32 1.1754944e-38, %v1161_v35  ;;  %vm1160_vm2 = vcmp.eq.f32.partialorder %v1159_v39, 8.507059e+37 }
 0x356   :  { %v1610_v24 = vpop.eup %1609 }
 0x357   :  { %v1151_v28 = vmul.f32 %v1610_v24, %v1148_v17  ;;  %v1612_v30 = vpop.eup %1611  ;;  %vm1156_vm7 = vweird.f32 %v1610_v24 }
 0x358   :  { %v939_v31 = vadd.f32 1.0, %v1612_v30  ;;  %v1614_v36 = vpop.eup %1613  ;;  %vm1157_vm15 = vmor %vm1155_vm1, %vm1156_vm7 }
 0x359   :  { %v1152_v18 = vsub.f32 1.0, %v1151_v28  ;;  %v1149_v47 = vadd.f32 1.0, %v1614_v36 }
 0x35a   :  { %1615 = vrcp.f32 %v939_v31  ;;  %v966_v11 = vand.u32 2147483648, %v939_v31  ;;  %vm960_vm4 = vweird.f32 %v939_v31  ;;  %v964_v13 = vand.u32 2147483647, %v939_v31 }
 0x35b   :  { %v1153_v32 = vmul.f32 %v1610_v24, %v1152_v18  ;;  %1617 = vrcp.f32 %v1149_v47  ;;  %vm1170_vm9 = vweird.f32 %v1149_v47  ;;  %v1174_v52 = vand.u32 2147483647, %v1149_v47 }
 0x35c   :  { %v967_v16 = vor.u32 1.1754944e-38, %v966_v11  ;;  %vm965_vm6 = vcmp.eq.f32.partialorder %v964_v13, 8.507059e+37  ;;  %v1202_v18 = vadd.f32 %v1201_v2, %v1180_v44 }
 0x35d   :  { %v1154_v34 = vadd.f32 %v1610_v24, %v1153_v32  ;;  %vm1175_vm11 = vcmp.eq.f32.partialorder %v1174_v52, 8.507059e+37 }
 0x35f   :  { %v1158_v42 = vsel %vm1157_vm15, %v1610_v24, %v1154_v34 }
 0x360   :  { %v1616_v48 = vpop.eup %1615  ;;  %v1163_v50 = vsel %vm1160_vm2, %v1162_v45, %v1158_v42  ;;  %v1246_v45 = vpop.f32.mrf.mxu3 }
 0x361   :  { %v956_v55 = vmul.f32 %v1616_v48, %v939_v31  ;;  %v1204_v9 = vmul.f32 %v1199_v53, %v1163_v50  ;;  %v1618_v63 = vpop.eup %1617  ;;  %vm961_vm3 = vweird.f32 %v1616_v48  ;;  %v1040_v31 = vadd.f32 %v2354_v33, %v1010_v51 }
 0x362   :  { %v1316_v20 = vpop.f32.mrf.mxu1  ;;  %v1166_v5 = vmul.f32 %v1618_v63, %v1149_v47  ;;  %vm962_vm5 = vmor %vm960_vm4, %vm961_vm3  ;;  %vm1171_vm8 = vweird.f32 %v1618_v63 }
 0x363   :  { %v1317_v21 = vadd.f32 %v1316_v20, %v1292_v19  ;;  %v957_v56 = vsub.f32 1.0, %v956_v55  ;;  %v1206_v14 = vadd.f32 %v1204_v9, %v1037_v49  ;;  %vm1172_vm10 = vmor %vm1170_vm9, %vm1171_vm8 }
 0x364   :  { %v1167_v12 = vsub.f32 1.0, %v1166_v5 }
 0x365   :  { %1519 = vmatmul.msk.f32.vlgmr.msrb.gmra.mxu2 %vm268_vm0, %v1317_v21  ;;  %1521 = vmatmul.msk.f32.vlgmr.msra.gmra.mxu3 %vm268_vm0, %v1317_v21  ;;  %v958_v3 = vmul.f32 %v1616_v48, %v957_v56  ;;  %v1176_v21 = vand.u32 2147483648, %v1149_v47 }
 0x367   :  { %v959_v10 = vadd.f32 %v1616_v48, %v958_v3 }
 0x368   :  { %v1249_v33 = vpop.f32.mrf.mxu3 }
 0x369   :  { %v963_v15 = vsel %vm962_vm5, %v1616_v48, %v959_v10 }
 0x36a   :  { %v1319_v25 = vpop.f32.mrf.mxu1 }
 0x36b   :  { %v1320_v27 = vadd.f32 %v1319_v25, %v1292_v19  ;;  %v992_v19 = vadd.f32 %v2343_v61, %v970_v41  ;;  %v1177_v25 = vor.u32 1.1754944e-38, %v1176_v21 }
 0x36d   :  { %1520 = vmatmul.msk.f32.gmra.mxu2 %vm268_vm0, %v1320_v27  ;;  %1522 = vmatmul.msk.f32.gmra.mxu3 %vm268_vm0, %v1320_v27  ;;  %v1000_v40 = vpop.permute.xlu2 %999 }
 0x36e   :  { %v1006_v60 = vmul.f32 %v1000_v40, %v2324_v59  ;;  %v1168_v59 = vmul.f32 %v1618_v63, %v1167_v12 }
 0x370   :  { %v1169_v20 = vadd.f32 %v1618_v63, %v1168_v59 }
 0x372   :  { %v1173_v24 = vsel %vm1172_vm10, %v1618_v63, %v1169_v20 }
 0x373   :  { %v1178_v29 = vsel %vm1175_vm11, %v1177_v25, %v1173_v24 }
 0x374   :  { %v1205_v30 = vmul.f32 %v1202_v18, %v1178_v29 }
 0x376   :  { %v1210_v57 = vpop.permute.xlu2 %1209  ;;  %v1207_v32 = vadd.f32 %v1205_v30, %v1040_v31 }
 0x377   :  { %v1216_v0 = vmul.f32 %v1210_v57, %v1206_v14  ;;  %v1220_v14 = vperm.slane %v2279_v7, 3 }
 0x379   :  { %v1247_v11 = vadd.f32 %v1246_v45, %v1220_v14  ;;  %v1250_v24 = vadd.f32 %v1249_v33, %v1220_v14 }
 0x385   :  { %v789_v58 = vpop.permute.xlu0 %788 }
 0x386   :  { %v796_v62 = vmul.f32 %v789_v58, %v2290_v37  ;;  %v968_v37 = vsel %vm965_vm6, %v967_v16, %v963_v15 }
 0x387   :  { %v995_v22 = vmul.f32 %v992_v19, %v968_v37 }
 0x388   :  { %v1008_v1 = vadd.f32 %v1006_v60, %v796_v62  ;;  %v1390_v60 = vperm.slane %v2274_v4, 3 }
 0x389   :  { %v997_v27 = vadd.f32 %v995_v22, %v830_v23 }
 0x38a   :  { %v2360_v8 = vadd.f32 %v1216_v0, %v1008_v1 }
 0x393   :  { %v794_v17 = vpop.permute.xlu1 %793 }
 0x394   :  { %v797_v41 = vmul.f32 %v794_v17, %v2294_v54  ;;  %v1420_v17 = vpop.permute.xlu2 %1419 }
 0x39c   :  { %v1004_v28 = vpop.permute.xlu1 %1003 }
 0x39d   :  { %v1007_v61 = vmul.f32 %v1004_v28, %v997_v27  ;;  %v1424_v27 = vpop.permute.xlu0 %1423 }
 0x39f   :  { %v1009_v38 = vadd.f32 %v1007_v61, %v797_v41 }
 0x3a5   :  { %v1214_v34 = vpop.permute.xlu1 %1213 }
 0x3a6   :  { %v1217_v35 = vmul.f32 %v1214_v34, %v1207_v32 }
 0x3a8   :  { %v2370_v6 = vadd.f32 %v1217_v35, %v1009_v38 }
 0x3e8   :  { %v1346_v36 = vpop.f32.mrf.mxu2  ;;  %v1408_v56 = vpop.f32.mrf.mxu3 }
 0x3e9   :  { %v1347_v39 = vadd.f32 %v1346_v36, %v1322_v43  ;;  %v1409_v3 = vadd.f32 %v1408_v56, %v1390_v60 }
 0x3eb   :  { %v1352_v40 = vsub.f32 0.0, %v1347_v39 }
 0x3ed   :  { %v1354_v42 = vmul.f32 1.442695, %v1352_v40 }
 0x3ef   :  { %1619 = vpow2.f32 %v1354_v42 }
 0x3f0   :  { %v1349_v54 = vpop.f32.mrf.mxu2  ;;  %v1411_v7 = vpop.f32.mrf.mxu3 }
 0x3f1   :  { %v1350_v46 = vadd.f32 %v1349_v54, %v1322_v43  ;;  %v1412_v52 = vadd.f32 %v1411_v7, %v1390_v60 }
 0x3f3   :  { %v1353_v44 = vsub.f32 0.0, %v1350_v46 }
 0x3f5   :  { %v1620_v47 = vpop.eup %1619  ;;  %v1356_v48 = vmul.f32 1.442695, %v1353_v44 }
 0x3f6   :  { %v1358_v50 = vadd.f32 1.0, %v1620_v47 }
 0x3f7   :  { %1621 = vpow2.f32 %v1356_v48 }
 0x3f8   :  { %1623 = vrcp.f32 %v1358_v50  ;;  %v1371_v49 = vand.u32 2147483648, %v1358_v50  ;;  %v1369_v58 = vand.u32 2147483647, %v1358_v50  ;;  %vm1365_vm13 = vweird.f32 %v1358_v50 }
 0x3fa   :  { %v1372_v0 = vor.u32 1.1754944e-38, %v1371_v49  ;;  %vm1370_vm7 = vcmp.eq.f32.partialorder %v1369_v58, 8.507059e+37 }
 0x3fd   :  { %v1622_v51 = vpop.eup %1621 }
 0x3fe   :  { %v1624_v53 = vpop.eup %1623  ;;  %v1359_v55 = vadd.f32 1.0, %v1622_v51 }
 0x3ff   :  { %v1361_v9 = vmul.f32 %v1624_v53, %v1358_v50  ;;  %vm1366_vm12 = vweird.f32 %v1624_v53 }
 0x400   :  { %1625 = vrcp.f32 %v1359_v55  ;;  %vm1367_vm14 = vmor %vm1365_vm13, %vm1366_vm12  ;;  %v1386_v15 = vand.u32 2147483648, %v1359_v55  ;;  %v1384_v4 = vand.u32 2147483647, %v1359_v55  ;;  %vm1380_vm15 = vweird.f32 %v1359_v55 }
 0x401   :  { %v1362_v26 = vsub.f32 1.0, %v1361_v9 }
 0x402   :  { %v1387_v20 = vor.u32 1.1754944e-38, %v1386_v15  ;;  %vm1385_vm3 = vcmp.eq.f32.partialorder %v1384_v4, 8.507059e+37 }
 0x403   :  { %v1363_v57 = vmul.f32 %v1624_v53, %v1362_v26 }
 0x405   :  { %v1364_v62 = vadd.f32 %v1624_v53, %v1363_v57 }
 0x406   :  { %v1626_v63 = vpop.eup %1625 }
 0x407   :  { %v1368_v1 = vsel %vm1367_vm14, %v1624_v53, %v1364_v62  ;;  %v1376_v5 = vmul.f32 %v1626_v63, %v1359_v55  ;;  %vm1381_vm1 = vweird.f32 %v1626_v63 }
 0x408   :  { %v1373_v10 = vsel %vm1370_vm7, %v1372_v0, %v1368_v1  ;;  %vm1382_vm2 = vmor %vm1380_vm15, %vm1381_vm1 }
 0x409   :  { %v1414_v12 = vmul.f32 %v1409_v3, %v1373_v10  ;;  %v1377_v13 = vsub.f32 1.0, %v1376_v5 }
 0x40b   :  { %v1416_v16 = vadd.f32 %v1414_v12, %v1247_v11  ;;  %v1378_v59 = vmul.f32 %v1626_v63, %v1377_v13 }
 0x40d   :  { %v1426_v37 = vmul.f32 %v1420_v17, %v1416_v16  ;;  %v1379_v19 = vadd.f32 %v1626_v63, %v1378_v59 }
 0x40f   :  { %v1428_v22 = vadd.f32 %v1426_v37, %v2360_v8  ;;  %v1383_v21 = vsel %vm1382_vm2, %v1626_v63, %v1379_v19 }
 0x410   :  { %v1388_v23 = vsel %vm1385_vm3, %v1387_v20, %v1383_v21 }
 0x411   :  { %1430 = vst.msk [vmem:[#allocation22] sm:$0xff] %vm268_vm0, %v1428_v22  ;;  %v1415_v25 = vmul.f32 %v1412_v52, %v1388_v23 }
 0x413   :  { %v1417_v2 = vadd.f32 %v1415_v25, %v1250_v24 }
 0x415   :  { %v1427_v28 = vmul.f32 %v1424_v27, %v1417_v2 }
 0x417   :  { %v1429_v29 = vadd.f32 %v1427_v28, %v2370_v6 }
 0x419   :  { %1431 = vst.msk [vmem:[#allocation22 + $0x8] sm:$0xff] %vm268_vm0, %v1429_v29 }
 0x41a   :  { %1444 = dma.vmem_to_hbm [thread:$0]  %s1437_s14, 256, %s1439_s17, [#allocation4], %s1959_s10, %s1959_s10, %s1960_s6  }
 0x41b   :  { %1953 = dma.done.wait [#allocation4], 256  }
 0x41c   :  { %1954 = vsyncadd [#allocation4], 4294967040 }
 0x41d   :  { %1453 = vsyncpa [#allocation3], 1 }
 0x41e   :  { %1454 = vsyncpa [#allocation6], 1 }
 0x41f   :  { %1455 = vsyncpa [#allocation9], 1 }
 0x420   :  { %1456 = vsyncpa [#allocation12], 1 }
 0x421   :  { %1457 = vsyncpa [#allocation15], 1 }
 0x422   :  { %1458 = vsyncpa [#allocation18], 1 }
 0x423   :  { %1459 = vsyncpa [#allocation21], 1 }
 0x424   :  { %1460 = vsyncpa [#allocation4], 1 }

</bundles_post_ra>
